<compile_context>
chip_gen: v7x
topology: tpu7x:2x2x1
jax: 0.10.0
libtpu: 0.0.40
codegen_flags: <defaults>
</compile_context>

<pallas_src>
import math
import functools

import jax
import jax.numpy as jnp
from jax.experimental import pallas as pl
from jax.experimental.pallas import tpu as pltpu

PAD = 0           # onmt.Constants.SRC_PAD
NEG_INF = -1e9    # masked_fill value (benign vs -inf)

VMEM_LIMIT_BYTES = 48 * 1024 * 1024   # above every default scoped limit, below every physical VMEM


# ----------------------------------------------------------------------------
# Shared layer-norm helper (f32 math, used inside the kernel)
# ----------------------------------------------------------------------------
def _layer_norm(x, g, b, eps=1e-5):
    mu = jnp.mean(x, axis=-1, keepdims=True)
    var = jnp.mean((x - mu) ** 2, axis=-1, keepdims=True)
    return (x - mu) * jax.lax.rsqrt(var + eps) * g + b


# ----------------------------------------------------------------------------
# Fused encoder-layer kernel: one (batch) grid step does the whole layer
# ----------------------------------------------------------------------------
def _encoder_layer_kernel(x_ref, bias_ref,
                          ln1g_ref, ln1b_ref, wqkv_ref, bqkv_ref,
                          wo_ref, bo_ref, ln2g_ref, ln2b_ref,
                          w1_ref, b1_ref, w2_ref, b2_ref,
                          lnfg_ref, lnfb_ref,
                          out_ref, *, n_heads, scale, apply_final_ln):
    x = x_ref[...]                                   # (L, D) f32 residual stream
    bias = bias_ref[...]                             # (1, L) f32 additive key-pad bias

    # --- self-attention block (pre-norm) -----------------------------------
    h = _layer_norm(x, ln1g_ref[...], ln1b_ref[...]).astype(jnp.bfloat16)
    qkv = jnp.dot(h, wqkv_ref[...],                  # one (L, D) @ (D, 3D) MXU matmul
                  preferred_element_type=jnp.float32) + bqkv_ref[...]
    L, D3 = qkv.shape
    D = D3 // 3
    Dh = D // n_heads

    q = (qkv[:, :D] * scale).astype(jnp.bfloat16)    # fold 1/sqrt(Dh) into q
    k = qkv[:, D:2 * D].astype(jnp.bfloat16)
    v = qkv[:, 2 * D:].astype(jnp.bfloat16)

    # Heads are contiguous lane ranges of q/k/v; loop is statically unrolled and the
    # final context is reassembled as one lane-dense (L, D) tile.
    # TODO(synk): for long sequences, tile keys with a flash-style online softmax to
    # bound the (L, L) score buffer (needed on v7x's 64 MiB VMEM at L >= ~2048).
    heads = []
    for hd in range(n_heads):
        sl = slice(hd * Dh, (hd + 1) * Dh)
        s = jax.lax.dot_general(q[:, sl], k[:, sl], (((1,), (1,)), ((), ())),
                                preferred_element_type=jnp.float32)   # (L, L)
        s = s + bias                                                   # key-pad mask
        m = jnp.max(s, axis=-1, keepdims=True)
        p = jnp.exp(s - m)
        p = p * pl.reciprocal(jnp.sum(p, axis=-1, keepdims=True), approx=True)
        heads.append(jnp.dot(p.astype(jnp.bfloat16), v[:, sl],
                             preferred_element_type=jnp.float32))      # (L, Dh)
    ctx = jnp.concatenate(heads, axis=-1).astype(jnp.bfloat16)         # (L, D) lane-dense

    attn = jnp.dot(ctx, wo_ref[...],                 # single full-K (L, D) @ (D, D)
                   preferred_element_type=jnp.float32) + bo_ref[...]
    x = x + attn                                     # residual (dropout = identity)

    # --- feed-forward block (pre-norm) --------------------------------------
    # TODO(synk): for large inner sizes on v7x, add an "arbitrary" grid axis tiling the
    # FFN inner dimension with an f32 VMEM accumulator instead of full w1/w2 blocks.
    h2 = _layer_norm(x, ln2g_ref[...], ln2b_ref[...]).astype(jnp.bfloat16)
    f = jnp.dot(h2, w1_ref[...], preferred_element_type=jnp.float32) + b1_ref[...]
    f = jnp.maximum(f, 0.0).astype(jnp.bfloat16)
    f = jnp.dot(f, w2_ref[...], preferred_element_type=jnp.float32) + b2_ref[...]
    x = x + f                                        # residual

    if apply_final_ln:                               # fused encoder post-process LN
        x = _layer_norm(x, lnfg_ref[...], lnfb_ref[...])
    out_ref[...] = x


def encoder_layer(x, bias, p, lnf_g, lnf_b, *, n_heads, apply_final_ln):
    """x: (B, L, D) f32 residual stream; bias: (B, 1, L) f32 additive key-pad bias."""
    B, L, D = x.shape
    scale = 1.0 / math.sqrt(D // n_heads)

    def const_spec(arr):
        # Constant block index across the grid -> single-buffered (no wasted VMEM copy).
        return pl.BlockSpec(arr.shape, lambda b: (0,) * arr.ndim,
                            pipeline_mode=pl.Buffered(1))

    weights = [p['ln1_g'], p['ln1_b'], p['wqkv'], p['bqkv'],
               p['wo'], p['bo'], p['ln2_g'], p['ln2_b'],
               p['w1'], p['b1'], p['w2'], p['b2'], lnf_g, lnf_b]

    row_spec = pl.BlockSpec((None, L, D), lambda b: (b, 0, 0))
    bias_spec = pl.BlockSpec((None, 1, L), lambda b: (b, 0, 0))

    return pl.pallas_call(
        functools.partial(_encoder_layer_kernel, n_heads=n_heads, scale=scale,
                          apply_final_ln=apply_final_ln),
        out_shape=jax.ShapeDtypeStruct((B, L, D), jnp.float32),
        grid=(B,),
        in_specs=[row_spec, bias_spec] + [const_spec(w) for w in weights],
        out_specs=row_spec,
        compiler_params=pltpu.CompilerParams(
            dimension_semantics=("parallel",),           # batch shards across TCs (v7x)
            vmem_limit_bytes=VMEM_LIMIT_BYTES),
    )(x, bias, *weights)
    # TODO(synk): for long sequences, add a query-tile grid axis (parallel) so each grid
    # step holds only a (tq, D) slice of the residual stream instead of the full (L, D).


# ----------------------------------------------------------------------------
# Parameter construction (deterministic, synthetic); matmul weights stored bf16,
# Q/K/V fused into a single (D, 3D) weight.
# ----------------------------------------------------------------------------
def init_params(key, vocab, d_model, inner, n_layers, max_len):
    keys = jax.random.split(key, 1 + n_layers)
    params = {}
    params['emb'] = jax.random.normal(keys[0], (vocab, d_model), jnp.float32) * 0.02

    # sinusoidal positional encoding table (time == 'positional_encoding')
    pos = jnp.arange(max_len, dtype=jnp.float32)[:, None]
    i = jnp.arange(d_model // 2, dtype=jnp.float32)[None, :]
    ang = pos / jnp.power(10000.0, 2.0 * i / d_model)
    pe = jnp.zeros((max_len, d_model), jnp.float32)
    pe = pe.at[:, 0::2].set(jnp.sin(ang))
    pe = pe.at[:, 1::2].set(jnp.cos(ang))
    params['pe'] = pe

    params['ln_g'] = jnp.ones((1, d_model), jnp.float32)   # encoder post-process LN
    params['ln_b'] = jnp.zeros((1, d_model), jnp.float32)

    def w(k, shape):  # bf16 storage for MXU inputs
        return (jax.random.normal(k, shape, jnp.float32) * 0.02).astype(jnp.bfloat16)

    layers = []
    for li in range(n_layers):
        lk = jax.random.split(keys[1 + li], 6)
        wq = w(lk[0], (d_model, d_model))
        wk = w(lk[1], (d_model, d_model))
        wv = w(lk[2], (d_model, d_model))
        layers.append(dict(
            wqkv=jnp.concatenate([wq, wk, wv], axis=1),           # (D, 3D) bf16
            bqkv=jnp.zeros((1, 3 * d_model), jnp.float32),
            wo=w(lk[3], (d_model, d_model)), bo=jnp.zeros((1, d_model), jnp.float32),
            ln1_g=jnp.ones((1, d_model), jnp.float32), ln1_b=jnp.zeros((1, d_model), jnp.float32),
            ln2_g=jnp.ones((1, d_model), jnp.float32), ln2_b=jnp.zeros((1, d_model), jnp.float32),
            w1=w(lk[4], (d_model, inner)), b1=jnp.zeros((1, inner), jnp.float32),
            w2=w(lk[5], (inner, d_model)), b2=jnp.zeros((1, d_model), jnp.float32),
        ))
    params['layers'] = layers
    return params


# ----------------------------------------------------------------------------
# Forward pass (mirrors TransformerEncoder.forward, inference mode)
# ----------------------------------------------------------------------------
def transformer_encoder_forward(src, params, n_heads, n_layers):
    B, L = src.shape
    D = params['emb'].shape[1]
    assert D % n_heads == 0

    mask_src = (src == PAD)[:, None, :]                       # (B, 1, L) bool
    # additive key-pad bias, hoisted once (head- and layer-independent)
    attn_bias = mask_src.astype(jnp.float32) * NEG_INF        # (B, 1, L)
    # TODO(synk): padded *query* rows are not masked (matches NMTGMinor; downstream code
    # is expected to apply src_mask).

    # TODO(synk): embedded_dropout / switchout / variational dropout are training-only;
    # plain lookup + identity dropout here (inference).
    emb = jnp.take(params['emb'], src, axis=0)                # (B, L, D)
    # emb*sqrt(D) + PE left to XLA — fuses with the gather.
    x = emb * math.sqrt(D) + params['pe'][:L][None, :, :]     # (B, L, D) f32

    for li in range(n_layers):
        x = encoder_layer(
            x, attn_bias, params['layers'][li], params['ln_g'], params['ln_b'],
            n_heads=n_heads, apply_final_ln=(li == n_layers - 1))

    context = jnp.transpose(x, (1, 0, 2))                     # (L, B, D) PyTorch convention
    return {'context': context, 'src_mask': mask_src}


# ----------------------------------------------------------------------------
if __name__ == "__main__":
    # small but lane/sublane-aligned "opt": model_size=128, n_heads=4, inner=256, layers=2
    B, L = 2, 16
    D_MODEL, N_HEADS, INNER, N_LAYERS, VOCAB, MAX_LEN = 128, 4, 256, 2, 64, 64

    key = jax.random.PRNGKey(0)
    k_src, k_par = jax.random.split(key)

    params = init_params(k_par, VOCAB, D_MODEL, INNER, N_LAYERS, MAX_LEN)

    src = jax.random.randint(k_src, (B, L), 1, VOCAB, dtype=jnp.int32)
    src = src.at[1, 12:].set(PAD)   # some padding in the second sequence

    fwd = jax.jit(functools.partial(transformer_encoder_forward,
                                    n_heads=N_HEADS, n_layers=N_LAYERS))
    out = fwd(src, params)
    ctx = jax.block_until_ready(out['context'])
    msk = jax.block_until_ready(out['src_mask'])

    assert ctx.shape == (L, B, D_MODEL)
    assert msk.shape == (B, 1, L)
    assert bool(jnp.all(jnp.isfinite(ctx)))
    print("KERNEL_OK")
</pallas_src>

<mosaic_0001>
module attributes {stable_mosaic.version = 11 : i64} {
  func.func @_encoder_layer_kernel(%arg0: i32, %arg1: memref<1x16x128xf32, #tpu.memory_space<vmem>>, %arg2: memref<1x1x16xf32, #tpu.memory_space<vmem>>, %arg3: memref<1x128xf32, #tpu.memory_space<vmem>>, %arg4: memref<1x128xf32, #tpu.memory_space<vmem>>, %arg5: memref<128x384xbf16, #tpu.memory_space<vmem>>, %arg6: memref<1x384xf32, #tpu.memory_space<vmem>>, %arg7: memref<128x128xbf16, #tpu.memory_space<vmem>>, %arg8: memref<1x128xf32, #tpu.memory_space<vmem>>, %arg9: memref<1x128xf32, #tpu.memory_space<vmem>>, %arg10: memref<1x128xf32, #tpu.memory_space<vmem>>, %arg11: memref<128x256xbf16, #tpu.memory_space<vmem>>, %arg12: memref<1x256xf32, #tpu.memory_space<vmem>>, %arg13: memref<256x128xbf16, #tpu.memory_space<vmem>>, %arg14: memref<1x128xf32, #tpu.memory_space<vmem>>, %arg15: memref<1x128xf32, #tpu.memory_space<vmem>>, %arg16: memref<1x128xf32, #tpu.memory_space<vmem>>, %arg17: memref<1x16x128xf32, #tpu.memory_space<vmem>>) attributes {dimension_semantics = [#tpu.dimension_semantics<parallel>], iteration_bounds = array<i64: 2>, scalar_prefetch = 0 : i64, scratch_operands = 0 : i64, tpu.core_type = #tpu.core_type<tc>, window_params = [{transform_indices = @transform_0, window_bounds = array<i64: 1, 16, 128>}, {transform_indices = @transform_1, window_bounds = array<i64: 1, 1, 16>}, {pipeline_mode = #tpu.pipeline_mode<synchronous>, transform_indices = @transform_2, window_bounds = array<i64: 1, 128>}, {pipeline_mode = #tpu.pipeline_mode<synchronous>, transform_indices = @transform_3, window_bounds = array<i64: 1, 128>}, {pipeline_mode = #tpu.pipeline_mode<synchronous>, transform_indices = @transform_4, window_bounds = array<i64: 128, 384>}, {pipeline_mode = #tpu.pipeline_mode<synchronous>, transform_indices = @transform_5, window_bounds = array<i64: 1, 384>}, {pipeline_mode = #tpu.pipeline_mode<synchronous>, transform_indices = @transform_6, window_bounds = array<i64: 128, 128>}, {pipeline_mode = #tpu.pipeline_mode<synchronous>, transform_indices = @transform_7, window_bounds = array<i64: 1, 128>}, {pipeline_mode = #tpu.pipeline_mode<synchronous>, transform_indices = @transform_8, window_bounds = array<i64: 1, 128>}, {pipeline_mode = #tpu.pipeline_mode<synchronous>, transform_indices = @transform_9, window_bounds = array<i64: 1, 128>}, {pipeline_mode = #tpu.pipeline_mode<synchronous>, transform_indices = @transform_10, window_bounds = array<i64: 128, 256>}, {pipeline_mode = #tpu.pipeline_mode<synchronous>, transform_indices = @transform_11, window_bounds = array<i64: 1, 256>}, {pipeline_mode = #tpu.pipeline_mode<synchronous>, transform_indices = @transform_12, window_bounds = array<i64: 256, 128>}, {pipeline_mode = #tpu.pipeline_mode<synchronous>, transform_indices = @transform_13, window_bounds = array<i64: 1, 128>}, {pipeline_mode = #tpu.pipeline_mode<synchronous>, transform_indices = @transform_14, window_bounds = array<i64: 1, 128>}, {pipeline_mode = #tpu.pipeline_mode<synchronous>, transform_indices = @transform_15, window_bounds = array<i64: 1, 128>}, {transform_indices = @transform_16, window_bounds = array<i64: 1, 16, 128>}]} {
    %c0 = arith.constant 0 : index
    %c0_0 = arith.constant 0 : index
    %c0_1 = arith.constant 0 : index
    %0 = vector.load %arg1[%c0, %c0_0, %c0_1] : memref<1x16x128xf32, #tpu.memory_space<vmem>>, vector<1x16x128xf32>
    %1 = vector.shape_cast %0 : vector<1x16x128xf32> to vector<16x128xf32>
    %c0_2 = arith.constant 0 : index
    %c0_3 = arith.constant 0 : index
    %c0_4 = arith.constant 0 : index
    %2 = vector.load %arg2[%c0_2, %c0_3, %c0_4] : memref<1x1x16xf32, #tpu.memory_space<vmem>>, vector<1x1x16xf32>
    %3 = vector.shape_cast %2 : vector<1x1x16xf32> to vector<1x16xf32>
    %c0_5 = arith.constant 0 : index
    %c0_6 = arith.constant 0 : index
    %4 = vector.load %arg3[%c0_5, %c0_6] : memref<1x128xf32, #tpu.memory_space<vmem>>, vector<1x128xf32>
    %c0_7 = arith.constant 0 : index
    %c0_8 = arith.constant 0 : index
    %5 = vector.load %arg4[%c0_7, %c0_8] : memref<1x128xf32, #tpu.memory_space<vmem>>, vector<1x128xf32>
    %cst = arith.constant dense<0.000000e+00> : vector<16xf32>
    %6 = vector.multi_reduction <add>, %1, %cst [1] : vector<16x128xf32> to vector<16xf32>
    %7 = vector.shape_cast %6 : vector<16xf32> to vector<16x1xf32>
    %cst_9 = arith.constant 1.280000e+02 : f32
    %8 = vector.broadcast %cst_9 : f32 to vector<16x1xf32>
    %9 = arith.divf %7, %8 : vector<16x1xf32>
    %10 = vector.broadcast %9 : vector<16x1xf32> to vector<16x128xf32>
    %11 = arith.subf %1, %10 : vector<16x128xf32>
    %12 = arith.mulf %11, %11 : vector<16x128xf32>
    %cst_10 = arith.constant dense<0.000000e+00> : vector<16xf32>
    %13 = vector.multi_reduction <add>, %12, %cst_10 [1] : vector<16x128xf32> to vector<16xf32>
    %14 = vector.shape_cast %13 : vector<16xf32> to vector<16x1xf32>
    %cst_11 = arith.constant 1.280000e+02 : f32
    %15 = vector.broadcast %cst_11 : f32 to vector<16x1xf32>
    %16 = arith.divf %14, %15 : vector<16x1xf32>
    %17 = vector.broadcast %9 : vector<16x1xf32> to vector<16x128xf32>
    %18 = arith.subf %1, %17 : vector<16x128xf32>
    %cst_12 = arith.constant 9.99999974E-6 : f32
    %19 = vector.broadcast %cst_12 : f32 to vector<16x1xf32>
    %20 = arith.addf %16, %19 : vector<16x1xf32>
    %21 = math.rsqrt %20 : vector<16x1xf32>
    %22 = vector.broadcast %21 : vector<16x1xf32> to vector<16x128xf32>
    %23 = arith.mulf %18, %22 : vector<16x128xf32>
    %24 = vector.broadcast %4 : vector<1x128xf32> to vector<16x128xf32>
    %25 = arith.mulf %23, %24 : vector<16x128xf32>
    %26 = vector.broadcast %5 : vector<1x128xf32> to vector<16x128xf32>
    %27 = arith.addf %25, %26 : vector<16x128xf32>
    %28 = arith.truncf %27 : vector<16x128xf32> to vector<16x128xbf16>
    %c0_13 = arith.constant 0 : index
    %c0_14 = arith.constant 0 : index
    %29 = vector.load %arg5[%c0_13, %c0_14] : memref<128x384xbf16, #tpu.memory_space<vmem>>, vector<128x384xbf16>
    %cst_15 = arith.constant dense<0.000000e+00> : vector<16x384xf32>
    %30 = tpu.matmul %28, %29, %cst_15 {dimension_numbers = #tpu.dot_dimension_numbers<[1], [0], [0], [1], [0, 0, 1, 1], [], []>} : vector<16x128xbf16>, vector<128x384xbf16>, vector<16x384xf32> -> vector<16x384xf32>
    %c0_16 = arith.constant 0 : index
    %c0_17 = arith.constant 0 : index
    %31 = vector.load %arg6[%c0_16, %c0_17] : memref<1x384xf32, #tpu.memory_space<vmem>>, vector<1x384xf32>
    %32 = vector.broadcast %31 : vector<1x384xf32> to vector<16x384xf32>
    %33 = arith.addf %30, %32 : vector<16x384xf32>
    %34 = vector.extract_strided_slice %33 {offsets = [0, 0], sizes = [16, 128], strides = [1, 1]} : vector<16x384xf32> to vector<16x128xf32>
    %cst_18 = arith.constant 0.176776692 : f32
    %35 = vector.broadcast %cst_18 : f32 to vector<16x128xf32>
    %36 = arith.mulf %34, %35 : vector<16x128xf32>
    %37 = arith.truncf %36 : vector<16x128xf32> to vector<16x128xbf16>
    %38 = vector.extract_strided_slice %33 {offsets = [0, 128], sizes = [16, 128], strides = [1, 1]} : vector<16x384xf32> to vector<16x128xf32>
    %39 = arith.truncf %38 : vector<16x128xf32> to vector<16x128xbf16>
    %40 = vector.extract_strided_slice %33 {offsets = [0, 256], sizes = [16, 128], strides = [1, 1]} : vector<16x384xf32> to vector<16x128xf32>
    %41 = arith.truncf %40 : vector<16x128xf32> to vector<16x128xbf16>
    %42 = vector.extract_strided_slice %37 {offsets = [0, 0], sizes = [16, 32], strides = [1, 1]} : vector<16x128xbf16> to vector<16x32xbf16>
    %43 = vector.extract_strided_slice %39 {offsets = [0, 0], sizes = [16, 32], strides = [1, 1]} : vector<16x128xbf16> to vector<16x32xbf16>
    %cst_19 = arith.constant dense<0.000000e+00> : vector<16x16xf32>
    %44 = tpu.matmul %42, %43, %cst_19 {dimension_numbers = #tpu.dot_dimension_numbers<[1], [1], [0], [0], [0, 0, 1, 0], [], []>} : vector<16x32xbf16>, vector<16x32xbf16>, vector<16x16xf32> -> vector<16x16xf32>
    %45 = vector.broadcast %3 : vector<1x16xf32> to vector<16x16xf32>
    %46 = arith.addf %44, %45 : vector<16x16xf32>
    %cst_20 = arith.constant dense<0xFF800000> : vector<16xf32>
    %47 = vector.multi_reduction <maximumf>, %46, %cst_20 [1] : vector<16x16xf32> to vector<16xf32>
    %48 = vector.shape_cast %47 : vector<16xf32> to vector<16x1xf32>
    %49 = vector.broadcast %48 : vector<16x1xf32> to vector<16x16xf32>
    %50 = arith.subf %46, %49 : vector<16x16xf32>
    %51 = math.exp %50 : vector<16x16xf32>
    %cst_21 = arith.constant dense<0.000000e+00> : vector<16xf32>
    %52 = vector.multi_reduction <add>, %51, %cst_21 [1] : vector<16x16xf32> to vector<16xf32>
    %53 = vector.shape_cast %52 : vector<16xf32> to vector<16x1xf32>
    %54 = tpu.reciprocal %53 {approx = true} : vector<16x1xf32> -> vector<16x1xf32>
    %55 = vector.broadcast %54 : vector<16x1xf32> to vector<16x16xf32>
    %56 = arith.mulf %51, %55 : vector<16x16xf32>
    %57 = arith.truncf %56 : vector<16x16xf32> to vector<16x16xbf16>
    %58 = vector.extract_strided_slice %41 {offsets = [0, 0], sizes = [16, 32], strides = [1, 1]} : vector<16x128xbf16> to vector<16x32xbf16>
    %cst_22 = arith.constant dense<0.000000e+00> : vector<16x32xf32>
    %59 = tpu.matmul %57, %58, %cst_22 {dimension_numbers = #tpu.dot_dimension_numbers<[1], [0], [0], [1], [0, 0, 1, 1], [], []>} : vector<16x16xbf16>, vector<16x32xbf16>, vector<16x32xf32> -> vector<16x32xf32>
    %60 = vector.extract_strided_slice %37 {offsets = [0, 32], sizes = [16, 32], strides = [1, 1]} : vector<16x128xbf16> to vector<16x32xbf16>
    %61 = vector.extract_strided_slice %39 {offsets = [0, 32], sizes = [16, 32], strides = [1, 1]} : vector<16x128xbf16> to vector<16x32xbf16>
    %cst_23 = arith.constant dense<0.000000e+00> : vector<16x16xf32>
    %62 = tpu.matmul %60, %61, %cst_23 {dimension_numbers = #tpu.dot_dimension_numbers<[1], [1], [0], [0], [0, 0, 1, 0], [], []>} : vector<16x32xbf16>, vector<16x32xbf16>, vector<16x16xf32> -> vector<16x16xf32>
    %63 = vector.broadcast %3 : vector<1x16xf32> to vector<16x16xf32>
    %64 = arith.addf %62, %63 : vector<16x16xf32>
    %cst_24 = arith.constant dense<0xFF800000> : vector<16xf32>
    %65 = vector.multi_reduction <maximumf>, %64, %cst_24 [1] : vector<16x16xf32> to vector<16xf32>
    %66 = vector.shape_cast %65 : vector<16xf32> to vector<16x1xf32>
    %67 = vector.broadcast %66 : vector<16x1xf32> to vector<16x16xf32>
    %68 = arith.subf %64, %67 : vector<16x16xf32>
    %69 = math.exp %68 : vector<16x16xf32>
    %cst_25 = arith.constant dense<0.000000e+00> : vector<16xf32>
    %70 = vector.multi_reduction <add>, %69, %cst_25 [1] : vector<16x16xf32> to vector<16xf32>
    %71 = vector.shape_cast %70 : vector<16xf32> to vector<16x1xf32>
    %72 = tpu.reciprocal %71 {approx = true} : vector<16x1xf32> -> vector<16x1xf32>
    %73 = vector.broadcast %72 : vector<16x1xf32> to vector<16x16xf32>
    %74 = arith.mulf %69, %73 : vector<16x16xf32>
    %75 = arith.truncf %74 : vector<16x16xf32> to vector<16x16xbf16>
    %76 = vector.extract_strided_slice %41 {offsets = [0, 32], sizes = [16, 32], strides = [1, 1]} : vector<16x128xbf16> to vector<16x32xbf16>
    %cst_26 = arith.constant dense<0.000000e+00> : vector<16x32xf32>
    %77 = tpu.matmul %75, %76, %cst_26 {dimension_numbers = #tpu.dot_dimension_numbers<[1], [0], [0], [1], [0, 0, 1, 1], [], []>} : vector<16x16xbf16>, vector<16x32xbf16>, vector<16x32xf32> -> vector<16x32xf32>
    %78 = vector.extract_strided_slice %37 {offsets = [0, 64], sizes = [16, 32], strides = [1, 1]} : vector<16x128xbf16> to vector<16x32xbf16>
    %79 = vector.extract_strided_slice %39 {offsets = [0, 64], sizes = [16, 32], strides = [1, 1]} : vector<16x128xbf16> to vector<16x32xbf16>
    %cst_27 = arith.constant dense<0.000000e+00> : vector<16x16xf32>
    %80 = tpu.matmul %78, %79, %cst_27 {dimension_numbers = #tpu.dot_dimension_numbers<[1], [1], [0], [0], [0, 0, 1, 0], [], []>} : vector<16x32xbf16>, vector<16x32xbf16>, vector<16x16xf32> -> vector<16x16xf32>
    %81 = vector.broadcast %3 : vector<1x16xf32> to vector<16x16xf32>
    %82 = arith.addf %80, %81 : vector<16x16xf32>
    %cst_28 = arith.constant dense<0xFF800000> : vector<16xf32>
    %83 = vector.multi_reduction <maximumf>, %82, %cst_28 [1] : vector<16x16xf32> to vector<16xf32>
    %84 = vector.shape_cast %83 : vector<16xf32> to vector<16x1xf32>
    %85 = vector.broadcast %84 : vector<16x1xf32> to vector<16x16xf32>
    %86 = arith.subf %82, %85 : vector<16x16xf32>
    %87 = math.exp %86 : vector<16x16xf32>
    %cst_29 = arith.constant dense<0.000000e+00> : vector<16xf32>
    %88 = vector.multi_reduction <add>, %87, %cst_29 [1] : vector<16x16xf32> to vector<16xf32>
    %89 = vector.shape_cast %88 : vector<16xf32> to vector<16x1xf32>
    %90 = tpu.reciprocal %89 {approx = true} : vector<16x1xf32> -> vector<16x1xf32>
    %91 = vector.broadcast %90 : vector<16x1xf32> to vector<16x16xf32>
    %92 = arith.mulf %87, %91 : vector<16x16xf32>
    %93 = arith.truncf %92 : vector<16x16xf32> to vector<16x16xbf16>
    %94 = vector.extract_strided_slice %41 {offsets = [0, 64], sizes = [16, 32], strides = [1, 1]} : vector<16x128xbf16> to vector<16x32xbf16>
    %cst_30 = arith.constant dense<0.000000e+00> : vector<16x32xf32>
    %95 = tpu.matmul %93, %94, %cst_30 {dimension_numbers = #tpu.dot_dimension_numbers<[1], [0], [0], [1], [0, 0, 1, 1], [], []>} : vector<16x16xbf16>, vector<16x32xbf16>, vector<16x32xf32> -> vector<16x32xf32>
    %96 = vector.extract_strided_slice %37 {offsets = [0, 96], sizes = [16, 32], strides = [1, 1]} : vector<16x128xbf16> to vector<16x32xbf16>
    %97 = vector.extract_strided_slice %39 {offsets = [0, 96], sizes = [16, 32], strides = [1, 1]} : vector<16x128xbf16> to vector<16x32xbf16>
    %cst_31 = arith.constant dense<0.000000e+00> : vector<16x16xf32>
    %98 = tpu.matmul %96, %97, %cst_31 {dimension_numbers = #tpu.dot_dimension_numbers<[1], [1], [0], [0], [0, 0, 1, 0], [], []>} : vector<16x32xbf16>, vector<16x32xbf16>, vector<16x16xf32> -> vector<16x16xf32>
    %99 = vector.broadcast %3 : vector<1x16xf32> to vector<16x16xf32>
    %100 = arith.addf %98, %99 : vector<16x16xf32>
    %cst_32 = arith.constant dense<0xFF800000> : vector<16xf32>
    %101 = vector.multi_reduction <maximumf>, %100, %cst_32 [1] : vector<16x16xf32> to vector<16xf32>
    %102 = vector.shape_cast %101 : vector<16xf32> to vector<16x1xf32>
    %103 = vector.broadcast %102 : vector<16x1xf32> to vector<16x16xf32>
    %104 = arith.subf %100, %103 : vector<16x16xf32>
    %105 = math.exp %104 : vector<16x16xf32>
    %cst_33 = arith.constant dense<0.000000e+00> : vector<16xf32>
    %106 = vector.multi_reduction <add>, %105, %cst_33 [1] : vector<16x16xf32> to vector<16xf32>
    %107 = vector.shape_cast %106 : vector<16xf32> to vector<16x1xf32>
    %108 = tpu.reciprocal %107 {approx = true} : vector<16x1xf32> -> vector<16x1xf32>
    %109 = vector.broadcast %108 : vector<16x1xf32> to vector<16x16xf32>
    %110 = arith.mulf %105, %109 : vector<16x16xf32>
    %111 = arith.truncf %110 : vector<16x16xf32> to vector<16x16xbf16>
    %112 = vector.extract_strided_slice %41 {offsets = [0, 96], sizes = [16, 32], strides = [1, 1]} : vector<16x128xbf16> to vector<16x32xbf16>
    %cst_34 = arith.constant dense<0.000000e+00> : vector<16x32xf32>
    %113 = tpu.matmul %111, %112, %cst_34 {dimension_numbers = #tpu.dot_dimension_numbers<[1], [0], [0], [1], [0, 0, 1, 1], [], []>} : vector<16x16xbf16>, vector<16x32xbf16>, vector<16x32xf32> -> vector<16x32xf32>
    %114 = tpu.concatenate %59, %77, %95, %113 in 1 : vector<16x32xf32>, vector<16x32xf32>, vector<16x32xf32>, vector<16x32xf32> -> vector<16x128xf32>
    %115 = arith.truncf %114 : vector<16x128xf32> to vector<16x128xbf16>
    %c0_35 = arith.constant 0 : index
    %c0_36 = arith.constant 0 : index
    %116 = vector.load %arg7[%c0_35, %c0_36] : memref<128x128xbf16, #tpu.memory_space<vmem>>, vector<128x128xbf16>
    %cst_37 = arith.constant dense<0.000000e+00> : vector<16x128xf32>
    %117 = tpu.matmul %115, %116, %cst_37 {dimension_numbers = #tpu.dot_dimension_numbers<[1], [0], [0], [1], [0, 0, 1, 1], [], []>} : vector<16x128xbf16>, vector<128x128xbf16>, vector<16x128xf32> -> vector<16x128xf32>
    %c0_38 = arith.constant 0 : index
    %c0_39 = arith.constant 0 : index
    %118 = vector.load %arg8[%c0_38, %c0_39] : memref<1x128xf32, #tpu.memory_space<vmem>>, vector<1x128xf32>
    %119 = vector.broadcast %118 : vector<1x128xf32> to vector<16x128xf32>
    %120 = arith.addf %117, %119 : vector<16x128xf32>
    %121 = arith.addf %1, %120 : vector<16x128xf32>
    %c0_40 = arith.constant 0 : index
    %c0_41 = arith.constant 0 : index
    %122 = vector.load %arg9[%c0_40, %c0_41] : memref<1x128xf32, #tpu.memory_space<vmem>>, vector<1x128xf32>
    %c0_42 = arith.constant 0 : index
    %c0_43 = arith.constant 0 : index
    %123 = vector.load %arg10[%c0_42, %c0_43] : memref<1x128xf32, #tpu.memory_space<vmem>>, vector<1x128xf32>
    %cst_44 = arith.constant dense<0.000000e+00> : vector<16xf32>
    %124 = vector.multi_reduction <add>, %121, %cst_44 [1] : vector<16x128xf32> to vector<16xf32>
    %125 = vector.shape_cast %124 : vector<16xf32> to vector<16x1xf32>
    %cst_45 = arith.constant 1.280000e+02 : f32
    %126 = vector.broadcast %cst_45 : f32 to vector<16x1xf32>
    %127 = arith.divf %125, %126 : vector<16x1xf32>
    %128 = vector.broadcast %127 : vector<16x1xf32> to vector<16x128xf32>
    %129 = arith.subf %121, %128 : vector<16x128xf32>
    %130 = arith.mulf %129, %129 : vector<16x128xf32>
    %cst_46 = arith.constant dense<0.000000e+00> : vector<16xf32>
    %131 = vector.multi_reduction <add>, %130, %cst_46 [1] : vector<16x128xf32> to vector<16xf32>
    %132 = vector.shape_cast %131 : vector<16xf32> to vector<16x1xf32>
    %cst_47 = arith.constant 1.280000e+02 : f32
    %133 = vector.broadcast %cst_47 : f32 to vector<16x1xf32>
    %134 = arith.divf %132, %133 : vector<16x1xf32>
    %135 = vector.broadcast %127 : vector<16x1xf32> to vector<16x128xf32>
    %136 = arith.subf %121, %135 : vector<16x128xf32>
    %cst_48 = arith.constant 9.99999974E-6 : f32
    %137 = vector.broadcast %cst_48 : f32 to vector<16x1xf32>
    %138 = arith.addf %134, %137 : vector<16x1xf32>
    %139 = math.rsqrt %138 : vector<16x1xf32>
    %140 = vector.broadcast %139 : vector<16x1xf32> to vector<16x128xf32>
    %141 = arith.mulf %136, %140 : vector<16x128xf32>
    %142 = vector.broadcast %122 : vector<1x128xf32> to vector<16x128xf32>
    %143 = arith.mulf %141, %142 : vector<16x128xf32>
    %144 = vector.broadcast %123 : vector<1x128xf32> to vector<16x128xf32>
    %145 = arith.addf %143, %144 : vector<16x128xf32>
    %146 = arith.truncf %145 : vector<16x128xf32> to vector<16x128xbf16>
    %c0_49 = arith.constant 0 : index
    %c0_50 = arith.constant 0 : index
    %147 = vector.load %arg11[%c0_49, %c0_50] : memref<128x256xbf16, #tpu.memory_space<vmem>>, vector<128x256xbf16>
    %cst_51 = arith.constant dense<0.000000e+00> : vector<16x256xf32>
    %148 = tpu.matmul %146, %147, %cst_51 {dimension_numbers = #tpu.dot_dimension_numbers<[1], [0], [0], [1], [0, 0, 1, 1], [], []>} : vector<16x128xbf16>, vector<128x256xbf16>, vector<16x256xf32> -> vector<16x256xf32>
    %c0_52 = arith.constant 0 : index
    %c0_53 = arith.constant 0 : index
    %149 = vector.load %arg12[%c0_52, %c0_53] : memref<1x256xf32, #tpu.memory_space<vmem>>, vector<1x256xf32>
    %150 = vector.broadcast %149 : vector<1x256xf32> to vector<16x256xf32>
    %151 = arith.addf %148, %150 : vector<16x256xf32>
    %cst_54 = arith.constant 0.000000e+00 : f32
    %152 = vector.broadcast %cst_54 : f32 to vector<16x256xf32>
    %153 = arith.maximumf %151, %152 : vector<16x256xf32>
    %154 = arith.truncf %153 : vector<16x256xf32> to vector<16x256xbf16>
    %c0_55 = arith.constant 0 : index
    %c0_56 = arith.constant 0 : index
    %155 = vector.load %arg13[%c0_55, %c0_56] : memref<256x128xbf16, #tpu.memory_space<vmem>>, vector<256x128xbf16>
    %cst_57 = arith.constant dense<0.000000e+00> : vector<16x128xf32>
    %156 = tpu.matmul %154, %155, %cst_57 {dimension_numbers = #tpu.dot_dimension_numbers<[1], [0], [0], [1], [0, 0, 1, 1], [], []>} : vector<16x256xbf16>, vector<256x128xbf16>, vector<16x128xf32> -> vector<16x128xf32>
    %c0_58 = arith.constant 0 : index
    %c0_59 = arith.constant 0 : index
    %157 = vector.load %arg14[%c0_58, %c0_59] : memref<1x128xf32, #tpu.memory_space<vmem>>, vector<1x128xf32>
    %158 = vector.broadcast %157 : vector<1x128xf32> to vector<16x128xf32>
    %159 = arith.addf %156, %158 : vector<16x128xf32>
    %160 = arith.addf %121, %159 : vector<16x128xf32>
    %c0_60 = arith.constant 0 : index
    %c0_61 = arith.constant 0 : index
    %c0_62 = arith.constant 0 : index
    %161 = vector.load %arg17[%c0_60, %c0_61, %c0_62] : memref<1x16x128xf32, #tpu.memory_space<vmem>>, vector<1x16x128xf32>
    %162 = vector.shape_cast %161 : vector<1x16x128xf32> to vector<16x128xf32>
    %163 = vector.shape_cast %160 : vector<16x128xf32> to vector<1x16x128xf32>
    tpu.vector_store %arg17[%c0_60, %c0_61, %c0_62], %163 {strides = array<i32>} : memref<1x16x128xf32, #tpu.memory_space<vmem>>, vector<1x16x128xf32>,
    return
  }
  func.func @transform_0(%arg0: i32) -> (i32, i32, i32) {
    %c0_i32 = arith.constant 0 : i32
    %c0_i32_0 = arith.constant 0 : i32
    %c0_i32_1 = arith.constant 0 : i32
    return %arg0, %c0_i32, %c0_i32_0 : i32, i32, i32
  }
  func.func @transform_1(%arg0: i32) -> (i32, i32, i32) {
    %c0_i32 = arith.constant 0 : i32
    %c0_i32_0 = arith.constant 0 : i32
    %c0_i32_1 = arith.constant 0 : i32
    return %arg0, %c0_i32, %c0_i32_0 : i32, i32, i32
  }
  func.func @transform_2(%arg0: i32) -> (i32, i32) {
    %c0_i32 = arith.constant 0 : i32
    %c0_i32_0 = arith.constant 0 : i32
    %c0_i32_1 = arith.constant 0 : i32
    return %c0_i32, %c0_i32_0 : i32, i32
  }
  func.func @transform_3(%arg0: i32) -> (i32, i32) {
    %c0_i32 = arith.constant 0 : i32
    %c0_i32_0 = arith.constant 0 : i32
    %c0_i32_1 = arith.constant 0 : i32
    return %c0_i32, %c0_i32_0 : i32, i32
  }
  func.func @transform_4(%arg0: i32) -> (i32, i32) {
    %c0_i32 = arith.constant 0 : i32
    %c0_i32_0 = arith.constant 0 : i32
    %c0_i32_1 = arith.constant 0 : i32
    return %c0_i32, %c0_i32_0 : i32, i32
  }
  func.func @transform_5(%arg0: i32) -> (i32, i32) {
    %c0_i32 = arith.constant 0 : i32
    %c0_i32_0 = arith.constant 0 : i32
    %c0_i32_1 = arith.constant 0 : i32
    return %c0_i32, %c0_i32_0 : i32, i32
  }
  func.func @transform_6(%arg0: i32) -> (i32, i32) {
    %c0_i32 = arith.constant 0 : i32
    %c0_i32_0 = arith.constant 0 : i32
    %c0_i32_1 = arith.constant 0 : i32
    return %c0_i32, %c0_i32_0 : i32, i32
  }
  func.func @transform_7(%arg0: i32) -> (i32, i32) {
    %c0_i32 = arith.constant 0 : i32
    %c0_i32_0 = arith.constant 0 : i32
    %c0_i32_1 = arith.constant 0 : i32
    return %c0_i32, %c0_i32_0 : i32, i32
  }
  func.func @transform_8(%arg0: i32) -> (i32, i32) {
    %c0_i32 = arith.constant 0 : i32
    %c0_i32_0 = arith.constant 0 : i32
    %c0_i32_1 = arith.constant 0 : i32
    return %c0_i32, %c0_i32_0 : i32, i32
  }
  func.func @transform_9(%arg0: i32) -> (i32, i32) {
    %c0_i32 = arith.constant 0 : i32
    %c0_i32_0 = arith.constant 0 : i32
    %c0_i32_1 = arith.constant 0 : i32
    return %c0_i32, %c0_i32_0 : i32, i32
  }
  func.func @transform_10(%arg0: i32) -> (i32, i32) {
    %c0_i32 = arith.constant 0 : i32
    %c0_i32_0 = arith.constant 0 : i32
    %c0_i32_1 = arith.constant 0 : i32
    return %c0_i32, %c0_i32_0 : i32, i32
  }
  func.func @transform_11(%arg0: i32) -> (i32, i32) {
    %c0_i32 = arith.constant 0 : i32
    %c0_i32_0 = arith.constant 0 : i32
    %c0_i32_1 = arith.constant 0 : i32
    return %c0_i32, %c0_i32_0 : i32, i32
  }
  func.func @transform_12(%arg0: i32) -> (i32, i32) {
    %c0_i32 = arith.constant 0 : i32
    %c0_i32_0 = arith.constant 0 : i32
    %c0_i32_1 = arith.constant 0 : i32
    return %c0_i32, %c0_i32_0 : i32, i32
  }
  func.func @transform_13(%arg0: i32) -> (i32, i32) {
    %c0_i32 = arith.constant 0 : i32
    %c0_i32_0 = arith.constant 0 : i32
    %c0_i32_1 = arith.constant 0 : i32
    return %c0_i32, %c0_i32_0 : i32, i32
  }
  func.func @transform_14(%arg0: i32) -> (i32, i32) {
    %c0_i32 = arith.constant 0 : i32
    %c0_i32_0 = arith.constant 0 : i32
    %c0_i32_1 = arith.constant 0 : i32
    return %c0_i32, %c0_i32_0 : i32, i32
  }
  func.func @transform_15(%arg0: i32) -> (i32, i32) {
    %c0_i32 = arith.constant 0 : i32
    %c0_i32_0 = arith.constant 0 : i32
    %c0_i32_1 = arith.constant 0 : i32
    return %c0_i32, %c0_i32_0 : i32, i32
  }
  func.func @transform_16(%arg0: i32) -> (i32, i32, i32) {
    %c0_i32 = arith.constant 0 : i32
    %c0_i32_0 = arith.constant 0 : i32
    %c0_i32_1 = arith.constant 0 : i32
    return %arg0, %c0_i32, %c0_i32_0 : i32, i32, i32
  }
}

module attributes {stable_mosaic.version = 11 : i64} {
  func.func @_encoder_layer_kernel(%arg0: i32, %arg1: memref<1x16x128xf32, #tpu.memory_space<vmem>>, %arg2: memref<1x1x16xf32, #tpu.memory_space<vmem>>, %arg3: memref<1x128xf32, #tpu.memory_space<vmem>>, %arg4: memref<1x128xf32, #tpu.memory_space<vmem>>, %arg5: memref<128x384xbf16, #tpu.memory_space<vmem>>, %arg6: memref<1x384xf32, #tpu.memory_space<vmem>>, %arg7: memref<128x128xbf16, #tpu.memory_space<vmem>>, %arg8: memref<1x128xf32, #tpu.memory_space<vmem>>, %arg9: memref<1x128xf32, #tpu.memory_space<vmem>>, %arg10: memref<1x128xf32, #tpu.memory_space<vmem>>, %arg11: memref<128x256xbf16, #tpu.memory_space<vmem>>, %arg12: memref<1x256xf32, #tpu.memory_space<vmem>>, %arg13: memref<256x128xbf16, #tpu.memory_space<vmem>>, %arg14: memref<1x128xf32, #tpu.memory_space<vmem>>, %arg15: memref<1x128xf32, #tpu.memory_space<vmem>>, %arg16: memref<1x128xf32, #tpu.memory_space<vmem>>, %arg17: memref<1x16x128xf32, #tpu.memory_space<vmem>>) attributes {dimension_semantics = [#tpu.dimension_semantics<parallel>], iteration_bounds = array<i64: 2>, scalar_prefetch = 0 : i64, scratch_operands = 0 : i64, tpu.core_type = #tpu.core_type<tc>, window_params = [{transform_indices = @transform_0, window_bounds = array<i64: 1, 16, 128>}, {transform_indices = @transform_1, window_bounds = array<i64: 1, 1, 16>}, {pipeline_mode = #tpu.pipeline_mode<synchronous>, transform_indices = @transform_2, window_bounds = array<i64: 1, 128>}, {pipeline_mode = #tpu.pipeline_mode<synchronous>, transform_indices = @transform_3, window_bounds = array<i64: 1, 128>}, {pipeline_mode = #tpu.pipeline_mode<synchronous>, transform_indices = @transform_4, window_bounds = array<i64: 128, 384>}, {pipeline_mode = #tpu.pipeline_mode<synchronous>, transform_indices = @transform_5, window_bounds = array<i64: 1, 384>}, {pipeline_mode = #tpu.pipeline_mode<synchronous>, transform_indices = @transform_6, window_bounds = array<i64: 128, 128>}, {pipeline_mode = #tpu.pipeline_mode<synchronous>, transform_indices = @transform_7, window_bounds = array<i64: 1, 128>}, {pipeline_mode = #tpu.pipeline_mode<synchronous>, transform_indices = @transform_8, window_bounds = array<i64: 1, 128>}, {pipeline_mode = #tpu.pipeline_mode<synchronous>, transform_indices = @transform_9, window_bounds = array<i64: 1, 128>}, {pipeline_mode = #tpu.pipeline_mode<synchronous>, transform_indices = @transform_10, window_bounds = array<i64: 128, 256>}, {pipeline_mode = #tpu.pipeline_mode<synchronous>, transform_indices = @transform_11, window_bounds = array<i64: 1, 256>}, {pipeline_mode = #tpu.pipeline_mode<synchronous>, transform_indices = @transform_12, window_bounds = array<i64: 256, 128>}, {pipeline_mode = #tpu.pipeline_mode<synchronous>, transform_indices = @transform_13, window_bounds = array<i64: 1, 128>}, {pipeline_mode = #tpu.pipeline_mode<synchronous>, transform_indices = @transform_14, window_bounds = array<i64: 1, 128>}, {pipeline_mode = #tpu.pipeline_mode<synchronous>, transform_indices = @transform_15, window_bounds = array<i64: 1, 128>}, {transform_indices = @transform_16, window_bounds = array<i64: 1, 16, 128>}]} {
    %c0 = arith.constant 0 : index
    %c0_0 = arith.constant 0 : index
    %c0_1 = arith.constant 0 : index
    %0 = vector.load %arg1[%c0, %c0_0, %c0_1] : memref<1x16x128xf32, #tpu.memory_space<vmem>>, vector<1x16x128xf32>
    %1 = vector.shape_cast %0 : vector<1x16x128xf32> to vector<16x128xf32>
    %c0_2 = arith.constant 0 : index
    %c0_3 = arith.constant 0 : index
    %c0_4 = arith.constant 0 : index
    %2 = vector.load %arg2[%c0_2, %c0_3, %c0_4] : memref<1x1x16xf32, #tpu.memory_space<vmem>>, vector<1x1x16xf32>
    %3 = vector.shape_cast %2 : vector<1x1x16xf32> to vector<1x16xf32>
    %c0_5 = arith.constant 0 : index
    %c0_6 = arith.constant 0 : index
    %4 = vector.load %arg3[%c0_5, %c0_6] : memref<1x128xf32, #tpu.memory_space<vmem>>, vector<1x128xf32>
    %c0_7 = arith.constant 0 : index
    %c0_8 = arith.constant 0 : index
    %5 = vector.load %arg4[%c0_7, %c0_8] : memref<1x128xf32, #tpu.memory_space<vmem>>, vector<1x128xf32>
    %cst = arith.constant dense<0.000000e+00> : vector<16xf32>
    %6 = vector.multi_reduction <add>, %1, %cst [1] : vector<16x128xf32> to vector<16xf32>
    %7 = vector.shape_cast %6 : vector<16xf32> to vector<16x1xf32>
    %cst_9 = arith.constant 1.280000e+02 : f32
    %8 = vector.broadcast %cst_9 : f32 to vector<16x1xf32>
    %9 = arith.divf %7, %8 : vector<16x1xf32>
    %10 = vector.broadcast %9 : vector<16x1xf32> to vector<16x128xf32>
    %11 = arith.subf %1, %10 : vector<16x128xf32>
    %12 = arith.mulf %11, %11 : vector<16x128xf32>
    %cst_10 = arith.constant dense<0.000000e+00> : vector<16xf32>
    %13 = vector.multi_reduction <add>, %12, %cst_10 [1] : vector<16x128xf32> to vector<16xf32>
    %14 = vector.shape_cast %13 : vector<16xf32> to vector<16x1xf32>
    %cst_11 = arith.constant 1.280000e+02 : f32
    %15 = vector.broadcast %cst_11 : f32 to vector<16x1xf32>
    %16 = arith.divf %14, %15 : vector<16x1xf32>
    %17 = vector.broadcast %9 : vector<16x1xf32> to vector<16x128xf32>
    %18 = arith.subf %1, %17 : vector<16x128xf32>
    %cst_12 = arith.constant 9.99999974E-6 : f32
    %19 = vector.broadcast %cst_12 : f32 to vector<16x1xf32>
    %20 = arith.addf %16, %19 : vector<16x1xf32>
    %21 = math.rsqrt %20 : vector<16x1xf32>
    %22 = vector.broadcast %21 : vector<16x1xf32> to vector<16x128xf32>
    %23 = arith.mulf %18, %22 : vector<16x128xf32>
    %24 = vector.broadcast %4 : vector<1x128xf32> to vector<16x128xf32>
    %25 = arith.mulf %23, %24 : vector<16x128xf32>
    %26 = vector.broadcast %5 : vector<1x128xf32> to vector<16x128xf32>
    %27 = arith.addf %25, %26 : vector<16x128xf32>
    %28 = arith.truncf %27 : vector<16x128xf32> to vector<16x128xbf16>
    %c0_13 = arith.constant 0 : index
    %c0_14 = arith.constant 0 : index
    %29 = vector.load %arg5[%c0_13, %c0_14] : memref<128x384xbf16, #tpu.memory_space<vmem>>, vector<128x384xbf16>
    %cst_15 = arith.constant dense<0.000000e+00> : vector<16x384xf32>
    %30 = tpu.matmul %28, %29, %cst_15 {dimension_numbers = #tpu.dot_dimension_numbers<[1], [0], [0], [1], [0, 0, 1, 1], [], []>} : vector<16x128xbf16>, vector<128x384xbf16>, vector<16x384xf32> -> vector<16x384xf32>
    %c0_16 = arith.constant 0 : index
    %c0_17 = arith.constant 0 : index
    %31 = vector.load %arg6[%c0_16, %c0_17] : memref<1x384xf32, #tpu.memory_space<vmem>>, vector<1x384xf32>
    %32 = vector.broadcast %31 : vector<1x384xf32> to vector<16x384xf32>
    %33 = arith.addf %30, %32 : vector<16x384xf32>
    %34 = vector.extract_strided_slice %33 {offsets = [0, 0], sizes = [16, 128], strides = [1, 1]} : vector<16x384xf32> to vector<16x128xf32>
    %cst_18 = arith.constant 0.176776692 : f32
    %35 = vector.broadcast %cst_18 : f32 to vector<16x128xf32>
    %36 = arith.mulf %34, %35 : vector<16x128xf32>
    %37 = arith.truncf %36 : vector<16x128xf32> to vector<16x128xbf16>
    %38 = vector.extract_strided_slice %33 {offsets = [0, 128], sizes = [16, 128], strides = [1, 1]} : vector<16x384xf32> to vector<16x128xf32>
    %39 = arith.truncf %38 : vector<16x128xf32> to vector<16x128xbf16>
    %40 = vector.extract_strided_slice %33 {offsets = [0, 256], sizes = [16, 128], strides = [1, 1]} : vector<16x384xf32> to vector<16x128xf32>
    %41 = arith.truncf %40 : vector<16x128xf32> to vector<16x128xbf16>
    %42 = vector.extract_strided_slice %37 {offsets = [0, 0], sizes = [16, 32], strides = [1, 1]} : vector<16x128xbf16> to vector<16x32xbf16>
    %43 = vector.extract_strided_slice %39 {offsets = [0, 0], sizes = [16, 32], strides = [1, 1]} : vector<16x128xbf16> to vector<16x32xbf16>
    %cst_19 = arith.constant dense<0.000000e+00> : vector<16x16xf32>
    %44 = tpu.matmul %42, %43, %cst_19 {dimension_numbers = #tpu.dot_dimension_numbers<[1], [1], [0], [0], [0, 0, 1, 0], [], []>} : vector<16x32xbf16>, vector<16x32xbf16>, vector<16x16xf32> -> vector<16x16xf32>
    %45 = vector.broadcast %3 : vector<1x16xf32> to vector<16x16xf32>
    %46 = arith.addf %44, %45 : vector<16x16xf32>
    %cst_20 = arith.constant dense<0xFF800000> : vector<16xf32>
    %47 = vector.multi_reduction <maximumf>, %46, %cst_20 [1] : vector<16x16xf32> to vector<16xf32>
    %48 = vector.shape_cast %47 : vector<16xf32> to vector<16x1xf32>
    %49 = vector.broadcast %48 : vector<16x1xf32> to vector<16x16xf32>
    %50 = arith.subf %46, %49 : vector<16x16xf32>
    %51 = math.exp %50 : vector<16x16xf32>
    %cst_21 = arith.constant dense<0.000000e+00> : vector<16xf32>
    %52 = vector.multi_reduction <add>, %51, %cst_21 [1] : vector<16x16xf32> to vector<16xf32>
    %53 = vector.shape_cast %52 : vector<16xf32> to vector<16x1xf32>
    %54 = tpu.reciprocal %53 {approx = true} : vector<16x1xf32> -> vector<16x1xf32>
    %55 = vector.broadcast %54 : vector<16x1xf32> to vector<16x16xf32>
    %56 = arith.mulf %51, %55 : vector<16x16xf32>
    %57 = arith.truncf %56 : vector<16x16xf32> to vector<16x16xbf16>
    %58 = vector.extract_strided_slice %41 {offsets = [0, 0], sizes = [16, 32], strides = [1, 1]} : vector<16x128xbf16> to vector<16x32xbf16>
    %cst_22 = arith.constant dense<0.000000e+00> : vector<16x32xf32>
    %59 = tpu.matmul %57, %58, %cst_22 {dimension_numbers = #tpu.dot_dimension_numbers<[1], [0], [0], [1], [0, 0, 1, 1], [], []>} : vector<16x16xbf16>, vector<16x32xbf16>, vector<16x32xf32> -> vector<16x32xf32>
    %60 = vector.extract_strided_slice %37 {offsets = [0, 32], sizes = [16, 32], strides = [1, 1]} : vector<16x128xbf16> to vector<16x32xbf16>
    %61 = vector.extract_strided_slice %39 {offsets = [0, 32], sizes = [16, 32], strides = [1, 1]} : vector<16x128xbf16> to vector<16x32xbf16>
    %cst_23 = arith.constant dense<0.000000e+00> : vector<16x16xf32>
    %62 = tpu.matmul %60, %61, %cst_23 {dimension_numbers = #tpu.dot_dimension_numbers<[1], [1], [0], [0], [0, 0, 1, 0], [], []>} : vector<16x32xbf16>, vector<16x32xbf16>, vector<16x16xf32> -> vector<16x16xf32>
    %63 = vector.broadcast %3 : vector<1x16xf32> to vector<16x16xf32>
    %64 = arith.addf %62, %63 : vector<16x16xf32>
    %cst_24 = arith.constant dense<0xFF800000> : vector<16xf32>
    %65 = vector.multi_reduction <maximumf>, %64, %cst_24 [1] : vector<16x16xf32> to vector<16xf32>
    %66 = vector.shape_cast %65 : vector<16xf32> to vector<16x1xf32>
    %67 = vector.broadcast %66 : vector<16x1xf32> to vector<16x16xf32>
    %68 = arith.subf %64, %67 : vector<16x16xf32>
    %69 = math.exp %68 : vector<16x16xf32>
    %cst_25 = arith.constant dense<0.000000e+00> : vector<16xf32>
    %70 = vector.multi_reduction <add>, %69, %cst_25 [1] : vector<16x16xf32> to vector<16xf32>
    %71 = vector.shape_cast %70 : vector<16xf32> to vector<16x1xf32>
    %72 = tpu.reciprocal %71 {approx = true} : vector<16x1xf32> -> vector<16x1xf32>
    %73 = vector.broadcast %72 : vector<16x1xf32> to vector<16x16xf32>
    %74 = arith.mulf %69, %73 : vector<16x16xf32>
    %75 = arith.truncf %74 : vector<16x16xf32> to vector<16x16xbf16>
    %76 = vector.extract_strided_slice %41 {offsets = [0, 32], sizes = [16, 32], strides = [1, 1]} : vector<16x128xbf16> to vector<16x32xbf16>
    %cst_26 = arith.constant dense<0.000000e+00> : vector<16x32xf32>
    %77 = tpu.matmul %75, %76, %cst_26 {dimension_numbers = #tpu.dot_dimension_numbers<[1], [0], [0], [1], [0, 0, 1, 1], [], []>} : vector<16x16xbf16>, vector<16x32xbf16>, vector<16x32xf32> -> vector<16x32xf32>
    %78 = vector.extract_strided_slice %37 {offsets = [0, 64], sizes = [16, 32], strides = [1, 1]} : vector<16x128xbf16> to vector<16x32xbf16>
    %79 = vector.extract_strided_slice %39 {offsets = [0, 64], sizes = [16, 32], strides = [1, 1]} : vector<16x128xbf16> to vector<16x32xbf16>
    %cst_27 = arith.constant dense<0.000000e+00> : vector<16x16xf32>
    %80 = tpu.matmul %78, %79, %cst_27 {dimension_numbers = #tpu.dot_dimension_numbers<[1], [1], [0], [0], [0, 0, 1, 0], [], []>} : vector<16x32xbf16>, vector<16x32xbf16>, vector<16x16xf32> -> vector<16x16xf32>
    %81 = vector.broadcast %3 : vector<1x16xf32> to vector<16x16xf32>
    %82 = arith.addf %80, %81 : vector<16x16xf32>
    %cst_28 = arith.constant dense<0xFF800000> : vector<16xf32>
    %83 = vector.multi_reduction <maximumf>, %82, %cst_28 [1] : vector<16x16xf32> to vector<16xf32>
    %84 = vector.shape_cast %83 : vector<16xf32> to vector<16x1xf32>
    %85 = vector.broadcast %84 : vector<16x1xf32> to vector<16x16xf32>
    %86 = arith.subf %82, %85 : vector<16x16xf32>
    %87 = math.exp %86 : vector<16x16xf32>
    %cst_29 = arith.constant dense<0.000000e+00> : vector<16xf32>
    %88 = vector.multi_reduction <add>, %87, %cst_29 [1] : vector<16x16xf32> to vector<16xf32>
    %89 = vector.shape_cast %88 : vector<16xf32> to vector<16x1xf32>
    %90 = tpu.reciprocal %89 {approx = true} : vector<16x1xf32> -> vector<16x1xf32>
    %91 = vector.broadcast %90 : vector<16x1xf32> to vector<16x16xf32>
    %92 = arith.mulf %87, %91 : vector<16x16xf32>
    %93 = arith.truncf %92 : vector<16x16xf32> to vector<16x16xbf16>
    %94 = vector.extract_strided_slice %41 {offsets = [0, 64], sizes = [16, 32], strides = [1, 1]} : vector<16x128xbf16> to vector<16x32xbf16>
    %cst_30 = arith.constant dense<0.000000e+00> : vector<16x32xf32>
    %95 = tpu.matmul %93, %94, %cst_30 {dimension_numbers = #tpu.dot_dimension_numbers<[1], [0], [0], [1], [0, 0, 1, 1], [], []>} : vector<16x16xbf16>, vector<16x32xbf16>, vector<16x32xf32> -> vector<16x32xf32>
    %96 = vector.extract_strided_slice %37 {offsets = [0, 96], sizes = [16, 32], strides = [1, 1]} : vector<16x128xbf16> to vector<16x32xbf16>
    %97 = vector.extract_strided_slice %39 {offsets = [0, 96], sizes = [16, 32], strides = [1, 1]} : vector<16x128xbf16> to vector<16x32xbf16>
    %cst_31 = arith.constant dense<0.000000e+00> : vector<16x16xf32>
    %98 = tpu.matmul %96, %97, %cst_31 {dimension_numbers = #tpu.dot_dimension_numbers<[1], [1], [0], [0], [0, 0, 1, 0], [], []>} : vector<16x32xbf16>, vector<16x32xbf16>, vector<16x16xf32> -> vector<16x16xf32>
    %99 = vector.broadcast %3 : vector<1x16xf32> to vector<16x16xf32>
    %100 = arith.addf %98, %99 : vector<16x16xf32>
    %cst_32 = arith.constant dense<0xFF800000> : vector<16xf32>
    %101 = vector.multi_reduction <maximumf>, %100, %cst_32 [1] : vector<16x16xf32> to vector<16xf32>
    %102 = vector.shape_cast %101 : vector<16xf32> to vector<16x1xf32>
    %103 = vector.broadcast %102 : vector<16x1xf32> to vector<16x16xf32>
    %104 = arith.subf %100, %103 : vector<16x16xf32>
    %105 = math.exp %104 : vector<16x16xf32>
    %cst_33 = arith.constant dense<0.000000e+00> : vector<16xf32>
    %106 = vector.multi_reduction <add>, %105, %cst_33 [1] : vector<16x16xf32> to vector<16xf32>
    %107 = vector.shape_cast %106 : vector<16xf32> to vector<16x1xf32>
    %108 = tpu.reciprocal %107 {approx = true} : vector<16x1xf32> -> vector<16x1xf32>
    %109 = vector.broadcast %108 : vector<16x1xf32> to vector<16x16xf32>
    %110 = arith.mulf %105, %109 : vector<16x16xf32>
    %111 = arith.truncf %110 : vector<16x16xf32> to vector<16x16xbf16>
    %112 = vector.extract_strided_slice %41 {offsets = [0, 96], sizes = [16, 32], strides = [1, 1]} : vector<16x128xbf16> to vector<16x32xbf16>
    %cst_34 = arith.constant dense<0.000000e+00> : vector<16x32xf32>
    %113 = tpu.matmul %111, %112, %cst_34 {dimension_numbers = #tpu.dot_dimension_numbers<[1], [0], [0], [1], [0, 0, 1, 1], [], []>} : vector<16x16xbf16>, vector<16x32xbf16>, vector<16x32xf32> -> vector<16x32xf32>
    %114 = tpu.concatenate %59, %77, %95, %113 in 1 : vector<16x32xf32>, vector<16x32xf32>, vector<16x32xf32>, vector<16x32xf32> -> vector<16x128xf32>
    %115 = arith.truncf %114 : vector<16x128xf32> to vector<16x128xbf16>
    %c0_35 = arith.constant 0 : index
    %c0_36 = arith.constant 0 : index
    %116 = vector.load %arg7[%c0_35, %c0_36] : memref<128x128xbf16, #tpu.memory_space<vmem>>, vector<128x128xbf16>
    %cst_37 = arith.constant dense<0.000000e+00> : vector<16x128xf32>
    %117 = tpu.matmul %115, %116, %cst_37 {dimension_numbers = #tpu.dot_dimension_numbers<[1], [0], [0], [1], [0, 0, 1, 1], [], []>} : vector<16x128xbf16>, vector<128x128xbf16>, vector<16x128xf32> -> vector<16x128xf32>
    %c0_38 = arith.constant 0 : index
    %c0_39 = arith.constant 0 : index
    %118 = vector.load %arg8[%c0_38, %c0_39] : memref<1x128xf32, #tpu.memory_space<vmem>>, vector<1x128xf32>
    %119 = vector.broadcast %118 : vector<1x128xf32> to vector<16x128xf32>
    %120 = arith.addf %117, %119 : vector<16x128xf32>
    %121 = arith.addf %1, %120 : vector<16x128xf32>
    %c0_40 = arith.constant 0 : index
    %c0_41 = arith.constant 0 : index
    %122 = vector.load %arg9[%c0_40, %c0_41] : memref<1x128xf32, #tpu.memory_space<vmem>>, vector<1x128xf32>
    %c0_42 = arith.constant 0 : index
    %c0_43 = arith.constant 0 : index
    %123 = vector.load %arg10[%c0_42, %c0_43] : memref<1x128xf32, #tpu.memory_space<vmem>>, vector<1x128xf32>
    %cst_44 = arith.constant dense<0.000000e+00> : vector<16xf32>
    %124 = vector.multi_reduction <add>, %121, %cst_44 [1] : vector<16x128xf32> to vector<16xf32>
    %125 = vector.shape_cast %124 : vector<16xf32> to vector<16x1xf32>
    %cst_45 = arith.constant 1.280000e+02 : f32
    %126 = vector.broadcast %cst_45 : f32 to vector<16x1xf32>
    %127 = arith.divf %125, %126 : vector<16x1xf32>
    %128 = vector.broadcast %127 : vector<16x1xf32> to vector<16x128xf32>
    %129 = arith.subf %121, %128 : vector<16x128xf32>
    %130 = arith.mulf %129, %129 : vector<16x128xf32>
    %cst_46 = arith.constant dense<0.000000e+00> : vector<16xf32>
    %131 = vector.multi_reduction <add>, %130, %cst_46 [1] : vector<16x128xf32> to vector<16xf32>
    %132 = vector.shape_cast %131 : vector<16xf32> to vector<16x1xf32>
    %cst_47 = arith.constant 1.280000e+02 : f32
    %133 = vector.broadcast %cst_47 : f32 to vector<16x1xf32>
    %134 = arith.divf %132, %133 : vector<16x1xf32>
    %135 = vector.broadcast %127 : vector<16x1xf32> to vector<16x128xf32>
    %136 = arith.subf %121, %135 : vector<16x128xf32>
    %cst_48 = arith.constant 9.99999974E-6 : f32
    %137 = vector.broadcast %cst_48 : f32 to vector<16x1xf32>
    %138 = arith.addf %134, %137 : vector<16x1xf32>
    %139 = math.rsqrt %138 : vector<16x1xf32>
    %140 = vector.broadcast %139 : vector<16x1xf32> to vector<16x128xf32>
    %141 = arith.mulf %136, %140 : vector<16x128xf32>
    %142 = vector.broadcast %122 : vector<1x128xf32> to vector<16x128xf32>
    %143 = arith.mulf %141, %142 : vector<16x128xf32>
    %144 = vector.broadcast %123 : vector<1x128xf32> to vector<16x128xf32>
    %145 = arith.addf %143, %144 : vector<16x128xf32>
    %146 = arith.truncf %145 : vector<16x128xf32> to vector<16x128xbf16>
    %c0_49 = arith.constant 0 : index
    %c0_50 = arith.constant 0 : index
    %147 = vector.load %arg11[%c0_49, %c0_50] : memref<128x256xbf16, #tpu.memory_space<vmem>>, vector<128x256xbf16>
    %cst_51 = arith.constant dense<0.000000e+00> : vector<16x256xf32>
    %148 = tpu.matmul %146, %147, %cst_51 {dimension_numbers = #tpu.dot_dimension_numbers<[1], [0], [0], [1], [0, 0, 1, 1], [], []>} : vector<16x128xbf16>, vector<128x256xbf16>, vector<16x256xf32> -> vector<16x256xf32>
    %c0_52 = arith.constant 0 : index
    %c0_53 = arith.constant 0 : index
    %149 = vector.load %arg12[%c0_52, %c0_53] : memref<1x256xf32, #tpu.memory_space<vmem>>, vector<1x256xf32>
    %150 = vector.broadcast %149 : vector<1x256xf32> to vector<16x256xf32>
    %151 = arith.addf %148, %150 : vector<16x256xf32>
    %cst_54 = arith.constant 0.000000e+00 : f32
    %152 = vector.broadcast %cst_54 : f32 to vector<16x256xf32>
    %153 = arith.maximumf %151, %152 : vector<16x256xf32>
    %154 = arith.truncf %153 : vector<16x256xf32> to vector<16x256xbf16>
    %c0_55 = arith.constant 0 : index
    %c0_56 = arith.constant 0 : index
    %155 = vector.load %arg13[%c0_55, %c0_56] : memref<256x128xbf16, #tpu.memory_space<vmem>>, vector<256x128xbf16>
    %cst_57 = arith.constant dense<0.000000e+00> : vector<16x128xf32>
    %156 = tpu.matmul %154, %155, %cst_57 {dimension_numbers = #tpu.dot_dimension_numbers<[1], [0], [0], [1], [0, 0, 1, 1], [], []>} : vector<16x256xbf16>, vector<256x128xbf16>, vector<16x128xf32> -> vector<16x128xf32>
    %c0_58 = arith.constant 0 : index
    %c0_59 = arith.constant 0 : index
    %157 = vector.load %arg14[%c0_58, %c0_59] : memref<1x128xf32, #tpu.memory_space<vmem>>, vector<1x128xf32>
    %158 = vector.broadcast %157 : vector<1x128xf32> to vector<16x128xf32>
    %159 = arith.addf %156, %158 : vector<16x128xf32>
    %160 = arith.addf %121, %159 : vector<16x128xf32>
    %c0_60 = arith.constant 0 : index
    %c0_61 = arith.constant 0 : index
    %161 = vector.load %arg15[%c0_60, %c0_61] : memref<1x128xf32, #tpu.memory_space<vmem>>, vector<1x128xf32>
    %c0_62 = arith.constant 0 : index
    %c0_63 = arith.constant 0 : index
    %162 = vector.load %arg16[%c0_62, %c0_63] : memref<1x128xf32, #tpu.memory_space<vmem>>, vector<1x128xf32>
    %cst_64 = arith.constant dense<0.000000e+00> : vector<16xf32>
    %163 = vector.multi_reduction <add>, %160, %cst_64 [1] : vector<16x128xf32> to vector<16xf32>
    %164 = vector.shape_cast %163 : vector<16xf32> to vector<16x1xf32>
    %cst_65 = arith.constant 1.280000e+02 : f32
    %165 = vector.broadcast %cst_65 : f32 to vector<16x1xf32>
    %166 = arith.divf %164, %165 : vector<16x1xf32>
    %167 = vector.broadcast %166 : vector<16x1xf32> to vector<16x128xf32>
    %168 = arith.subf %160, %167 : vector<16x128xf32>
    %169 = arith.mulf %168, %168 : vector<16x128xf32>
    %cst_66 = arith.constant dense<0.000000e+00> : vector<16xf32>
    %170 = vector.multi_reduction <add>, %169, %cst_66 [1] : vector<16x128xf32> to vector<16xf32>
    %171 = vector.shape_cast %170 : vector<16xf32> to vector<16x1xf32>
    %cst_67 = arith.constant 1.280000e+02 : f32
    %172 = vector.broadcast %cst_67 : f32 to vector<16x1xf32>
    %173 = arith.divf %171, %172 : vector<16x1xf32>
    %174 = vector.broadcast %166 : vector<16x1xf32> to vector<16x128xf32>
    %175 = arith.subf %160, %174 : vector<16x128xf32>
    %cst_68 = arith.constant 9.99999974E-6 : f32
    %176 = vector.broadcast %cst_68 : f32 to vector<16x1xf32>
    %177 = arith.addf %173, %176 : vector<16x1xf32>
    %178 = math.rsqrt %177 : vector<16x1xf32>
    %179 = vector.broadcast %178 : vector<16x1xf32> to vector<16x128xf32>
    %180 = arith.mulf %175, %179 : vector<16x128xf32>
    %181 = vector.broadcast %161 : vector<1x128xf32> to vector<16x128xf32>
    %182 = arith.mulf %180, %181 : vector<16x128xf32>
    %183 = vector.broadcast %162 : vector<1x128xf32> to vector<16x128xf32>
    %184 = arith.addf %182, %183 : vector<16x128xf32>
    %c0_69 = arith.constant 0 : index
    %c0_70 = arith.constant 0 : index
    %c0_71 = arith.constant 0 : index
    %185 = vector.load %arg17[%c0_69, %c0_70, %c0_71] : memref<1x16x128xf32, #tpu.memory_space<vmem>>, vector<1x16x128xf32>
    %186 = vector.shape_cast %185 : vector<1x16x128xf32> to vector<16x128xf32>
    %187 = vector.shape_cast %184 : vector<16x128xf32> to vector<1x16x128xf32>
    tpu.vector_store %arg17[%c0_69, %c0_70, %c0_71], %187 {strides = array<i32>} : memref<1x16x128xf32, #tpu.memory_space<vmem>>, vector<1x16x128xf32>,
    return
  }
  func.func @transform_0(%arg0: i32) -> (i32, i32, i32) {
    %c0_i32 = arith.constant 0 : i32
    %c0_i32_0 = arith.constant 0 : i32
    %c0_i32_1 = arith.constant 0 : i32
    return %arg0, %c0_i32, %c0_i32_0 : i32, i32, i32
  }
  func.func @transform_1(%arg0: i32) -> (i32, i32, i32) {
    %c0_i32 = arith.constant 0 : i32
    %c0_i32_0 = arith.constant 0 : i32
    %c0_i32_1 = arith.constant 0 : i32
    return %arg0, %c0_i32, %c0_i32_0 : i32, i32, i32
  }
  func.func @transform_2(%arg0: i32) -> (i32, i32) {
    %c0_i32 = arith.constant 0 : i32
    %c0_i32_0 = arith.constant 0 : i32
    %c0_i32_1 = arith.constant 0 : i32
    return %c0_i32, %c0_i32_0 : i32, i32
  }
  func.func @transform_3(%arg0: i32) -> (i32, i32) {
    %c0_i32 = arith.constant 0 : i32
    %c0_i32_0 = arith.constant 0 : i32
    %c0_i32_1 = arith.constant 0 : i32
    return %c0_i32, %c0_i32_0 : i32, i32
  }
  func.func @transform_4(%arg0: i32) -> (i32, i32) {
    %c0_i32 = arith.constant 0 : i32
    %c0_i32_0 = arith.constant 0 : i32
    %c0_i32_1 = arith.constant 0 : i32
    return %c0_i32, %c0_i32_0 : i32, i32
  }
  func.func @transform_5(%arg0: i32) -> (i32, i32) {
    %c0_i32 = arith.constant 0 : i32
    %c0_i32_0 = arith.constant 0 : i32
    %c0_i32_1 = arith.constant 0 : i32
    return %c0_i32, %c0_i32_0 : i32, i32
  }
  func.func @transform_6(%arg0: i32) -> (i32, i32) {
    %c0_i32 = arith.constant 0 : i32
    %c0_i32_0 = arith.constant 0 : i32
    %c0_i32_1 = arith.constant 0 : i32
    return %c0_i32, %c0_i32_0 : i32, i32
  }
  func.func @transform_7(%arg0: i32) -> (i32, i32) {
    %c0_i32 = arith.constant 0 : i32
    %c0_i32_0 = arith.constant 0 : i32
    %c0_i32_1 = arith.constant 0 : i32
    return %c0_i32, %c0_i32_0 : i32, i32
  }
  func.func @transform_8(%arg0: i32) -> (i32, i32) {
    %c0_i32 = arith.constant 0 : i32
    %c0_i32_0 = arith.constant 0 : i32
    %c0_i32_1 = arith.constant 0 : i32
    return %c0_i32, %c0_i32_0 : i32, i32
  }
  func.func @transform_9(%arg0: i32) -> (i32, i32) {
    %c0_i32 = arith.constant 0 : i32
    %c0_i32_0 = arith.constant 0 : i32
    %c0_i32_1 = arith.constant 0 : i32
    return %c0_i32, %c0_i32_0 : i32, i32
  }
  func.func @transform_10(%arg0: i32) -> (i32, i32) {
    %c0_i32 = arith.constant 0 : i32
    %c0_i32_0 = arith.constant 0 : i32
    %c0_i32_1 = arith.constant 0 : i32
    return %c0_i32, %c0_i32_0 : i32, i32
  }
  func.func @transform_11(%arg0: i32) -> (i32, i32) {
    %c0_i32 = arith.constant 0 : i32
    %c0_i32_0 = arith.constant 0 : i32
    %c0_i32_1 = arith.constant 0 : i32
    return %c0_i32, %c0_i32_0 : i32, i32
  }
  func.func @transform_12(%arg0: i32) -> (i32, i32) {
    %c0_i32 = arith.constant 0 : i32
    %c0_i32_0 = arith.constant 0 : i32
    %c0_i32_1 = arith.constant 0 : i32
    return %c0_i32, %c0_i32_0 : i32, i32
  }
  func.func @transform_13(%arg0: i32) -> (i32, i32) {
    %c0_i32 = arith.constant 0 : i32
    %c0_i32_0 = arith.constant 0 : i32
    %c0_i32_1 = arith.constant 0 : i32
    return %c0_i32, %c0_i32_0 : i32, i32
  }
  func.func @transform_14(%arg0: i32) -> (i32, i32) {
    %c0_i32 = arith.constant 0 : i32
    %c0_i32_0 = arith.constant 0 : i32
    %c0_i32_1 = arith.constant 0 : i32
    return %c0_i32, %c0_i32_0 : i32, i32
  }
  func.func @transform_15(%arg0: i32) -> (i32, i32) {
    %c0_i32 = arith.constant 0 : i32
    %c0_i32_0 = arith.constant 0 : i32
    %c0_i32_1 = arith.constant 0 : i32
    return %c0_i32, %c0_i32_0 : i32, i32
  }
  func.func @transform_16(%arg0: i32) -> (i32, i32, i32) {
    %c0_i32 = arith.constant 0 : i32
    %c0_i32_0 = arith.constant 0 : i32
    %c0_i32_1 = arith.constant 0 : i32
    return %arg0, %c0_i32, %c0_i32_0 : i32, i32, i32
  }
}

</mosaic_0001>

<bundles_post_ra>
// kernel: transformer_encoder_forward.2
= control target key start
LH: loop header
LB: loop body
LE: loop exit
PB: predicated region body
PF: predicated region fallthrough
CT: control target
= control target key end

     0   :  { %s2903_s0 = inlined_call_operand.vmem [shape: f32[2,16,128], index: 0, kind: input, shape index: {}]   ;;  %s2904_s1 = inlined_call_operand.vmem [shape: f32[2,1,16], index: 1, kind: input, shape index: {}]   ;;  %s2905_s2 = inlined_call_operand.vmem [shape: f32[1,128], index: 2, kind: input, shape index: {}]   ;;  %s2906_s3 = inlined_call_operand.vmem [shape: f32[1,128], index: 3, kind: input, shape index: {}]   ;;  %s2907_s4 = inlined_call_operand.vmem [shape: bf16[128,384], index: 4, kind: input, shape index: {}]   ;;  %s2908_s5 = inlined_call_operand.vmem [shape: f32[1,384], index: 5, kind: input, shape index: {}]   ;;  %s2909_s6 = inlined_call_operand.hbm [shape: bf16[128,128], index: 6, kind: input, shape index: {}]   ;;  %s2910_s7 = inlined_call_operand.vmem [shape: f32[1,128], index: 7, kind: input, shape index: {}]   ;;  %s2911_s8 = inlined_call_operand.vmem [shape: f32[1,128], index: 8, kind: input, shape index: {}]   ;;  %s2912_s9 = inlined_call_operand.vmem [shape: f32[1,128], index: 9, kind: input, shape index: {}]   ;;  %s2913_s10 = inlined_call_operand.vmem [shape: bf16[128,256], index: 10, kind: input, shape index: {}]   ;;  %s2914_s11 = inlined_call_operand.vmem [shape: f32[1,256], index: 11, kind: input, shape index: {}]   ;;  %s2915_s12 = inlined_call_operand.vmem [shape: bf16[256,128], index: 12, kind: input, shape index: {}]   ;;  %s2916_s13 = inlined_call_operand.vmem [shape: f32[1,128], index: 13, kind: input, shape index: {}]   ;;  %s2917_s14 = inlined_call_operand.vmem [shape: f32[1,128], index: 14, kind: input, shape index: {}]   ;;  %s2918_s15 = inlined_call_operand.vmem [shape: f32[1,128], index: 15, kind: input, shape index: {}]   ;;  %s2919_s16 = inlined_call_operand.vmem [shape: f32[2,16,128], index: 16, kind: output, shape index: {}]  }
   0x1   :  { %2922 = sst [smem:[#allocation5_spill]] %s2903_s0 }
   0x2   :  { %21 = vsyncpa [#allocation3], 0  ;;  %s2486_s21 = smov 0  }
   0x3 LB: > { %s2492_s22 = sadd.s32 4294967295, %s2390_s21   ;;  %p1954_p0 = scmp.ge.s32.totalorder %s2390_s21, 1  ;;  %s2390_s21 = sphi %s2486_s21, %s27_s21  }
   0x4   : > { %p404_p1 = scmp.lt.s32.totalorder %s2390_s21, 3  ;;  %s2392_s14 = smov [#allocation2]  }
   0x5   : > { %s428_s15 = sshll.u32 %s2392_s14, 4  ;;  %p2920_p3 = scmp.eq.s32.totalorder %s2492_s22, 0  ;;  %s429_s15 = int_to_ptr.vmem [resolvable:$true] %s428_s15 }
   0x6   : > { %p2496_p2 = pnand %p1954_p0, %p404_p1  ;;  %s2352_s27 = scalar_lea.hbm %s2909_s6, 1024 }
   0x7   : > { %p2353_p6 = scmp.ne.s32.totalorder %s2909_s6, %s2352_s27  ;;  %p2359_p10 = scmp.lt.u32.totalorder %s2352_s27, %s2909_s6 }
   0x8   : > { %s2923_s23 = scalar_select %p2496_p2, 1, 0 }
   0x9   : > { %p2194_p4 = pneg %p2496_p2 }
   0xb   : > { %p2505_p5 = pnand %p2920_p3, %p2194_p4 }
   0xd   : > { %p2354_p7 = pneg %p2505_p5 }
   0xf   : > { %p2355_p8 = pnand %p2354_p7, %p2353_p6 }
  0x11   : > { %p2356_p9 = pneg %p2355_p8 }
  0x13   : > { %p2361_p11 = pnand %p2359_p10, %p2356_p9 }
  0x15   : > { %2364 = shalt.err (!%p2361_p11)
}
  0x16   : > { %s2365_s17 = scalar_lea.vmem %s429_s15, 1024  ;;  %p2373_p1 = scmp.lt.s32.totalorder %s429_s15, %s429_s15 }
  0x17   : > { %p2366_p12 = scmp.ne.s32.totalorder %s429_s15, %s2365_s17  ;;  %p2374_p4 = scmp.lt.s32.totalorder %s2365_s17, %s2365_s17 }
  0x19   : > { %p2368_p13 = pnand %p2366_p12, %p2354_p7  ;;  %p2375_p3 = por %p2374_p4, %p2373_p1 }
  0x1b   : > { %p2369_p0 = pneg %p2368_p13 }
  0x1d   : > { %p2376_p2 = pnand %p2375_p3, %p2369_p0 }
  0x1f   : > { %2379 = shalt.err (!%p2376_p2)
}
  0x20   : > { %s2393_s18 = smov 64   ;;  %s2394_s19 = smov 4  }
  0x21   : > { %2197 = dma.hbm_to_vmem [thread:$0]  (!%p2505_p5), %s2909_s6, 1024, %s429_s15, [#allocation3], %s2393_s18, %s2393_s18, %s2394_s19  }
  0x22   : > { %p2925_p6 = scmp.ne.s32.totalorder %s2923_s23, 0 }
  0x23   : > { %p2926_p8 = scmp.eq.s32.totalorder (!%p2925_p6), %s2492_s22, 0 }
  0x24   : > { %485 = sbr.rel (%p2925_p6) target bundleno = 3012 (0xbc4), region = 84 }
  0x2b   : > { %2385 = dma.done.wait (%p2926_p8), [#allocation3], 1024   ;;  %p2927_p7 = pmov %p2926_p8 }
  0x2c   : > { %p538_p2 = scmp.lt.s32.totalorder %s2492_s22, 1  ;;  %s2928_s26 = sld [smem:[#allocation5_spill]]  ;;  %v2232_v2 = vld [vmem:[%s2907_s4 + $0x4] ss:$12 sps:$4 sm:$0xff]   ;;  %v2234_v3 = vld [vmem:[%s2907_s4] ss:$12 sps:$4 sm:$0xff]   ;;  %v631_v53 = vlaneseq }
  0x2d   : > { %2387 = vsyncadd (%p2927_p7), [#allocation3], 4294966272  ;;  %v2395_v4 = vmov 0.0   ;;  %v2235_v5 = vld [vmem:[%s2907_s4 + $0x8] ss:$12 sps:$4 sm:$0xff]   ;;  %774 = vmatprep.subr.bf16.mxu0 %v2232_v2  ;;  %v2396_v30 = vmov 0  }
  0x2e   : > { %s2930_s22 = smov (!%p538_p2, %s2492_s22), 1  ;;  %2102 = vmatprep.subr.bf16.mxu1 %v2395_v4  ;;  %v2236_v6 = vld [vmem:[%s2907_s4 + $0x1c] ss:$12 sps:$4 sm:$0xff]   ;;  %775 = vmatpush1.bf16.msra.mxu0 %v2234_v3  ;;  %v2238_v15 = vld [vmem:[%s2907_s4 + $0x18] ss:$12 sps:$4 sm:$0xff]   ;;  %vm2397_vm0 = vmmov 0  }
  0x2f   : > { %s2044_s24 = sshll.u32 %s2930_s22, 4  ;;  %2103 = vmatpush3.bf16.msra.mxu1 %v2235_v5  ;;  %776 = vmatprep.subr.bf16.mxu0 %v2236_v6  ;;  %v2239_v16 = vld [vmem:[%s2907_s4 + $0x20] ss:$12 sps:$4 sm:$0xff]   ;;  %v2242_v18 = vld [vmem:[%s2907_s4 + $0x30] ss:$12 sps:$4 sm:$0xff]   ;;  %v2654_v54 = vshrl.u32 %v631_v53, 7  ;;  %s545_s27 = scalar_lea.vmem %s2904_s1, %s2930_s22 }
  0x30   : > { %2104 = vmatprep.subr.bf16.mxu1 %v2395_v4  ;;  %v2240_v17 = vld [vmem:[%s2907_s4 + $0x34] ss:$12 sps:$4 sm:$0xff]   ;;  %v2243_v19 = vld [vmem:[%s2907_s4 + $0x38] ss:$12 sps:$4 sm:$0xff]   ;;  %v2247_v22 = vld [vmem:[%s2907_s4 + $0x50] ss:$12 sps:$4 sm:$0xff]   ;;  %806 = vmatprep.mubr.bf16.mxu0 %v2396_v30  ;;  %s550_s25 = scalar_lea.vmem %s2919_s16, %s2044_s24 }
  0x31   : > { %v2244_v20 = vld [vmem:[%s2907_s4 + $0x4c] ss:$12 sps:$4 sm:$0xff]   ;;  %v2246_v21 = vld [vmem:[%s2907_s4 + $0x48] ss:$12 sps:$4 sm:$0xff]   ;;  %v2248_v23 = vld [vmem:[%s2907_s4 + $0x64] ss:$12 sps:$4 sm:$0xff]   ;;  %2118 = vmatprep.mubr.msk.bf16.mxu1 %vm2397_vm0, %v2395_v4 }
  0x32   : > { %s542_s23 = scalar_lea.vmem %s2928_s26, %s2044_s24  ;;  %777 = vmatpush1.bf16.msra.mxu0 %v2238_v15  ;;  %v2250_v24 = vld [vmem:[%s2907_s4 + $0x60] ss:$12 sps:$4 sm:$0xff]   ;;  %v2251_v25 = vld [vmem:[%s2907_s4 + $0x68] ss:$12 sps:$4 sm:$0xff]   ;;  %v2254_v27 = vld [vmem:[%s2907_s4 + $0x78] ss:$12 sps:$4 sm:$0xff]  }
  0x33   : > { %v2541_v0 = vld [vmem:[%s542_s23] sm:$0xff]  ;;  %v2543_v1 = vld [vmem:[%s542_s23 + $0x8] sm:$0xff]  ;;  %2105 = vmatpush3.bf16.msra.mxu1 %v2239_v16  ;;  %778 = vmatprep.subr.bf16.mxu0 %v2240_v17  ;;  %v2258_v31 = vld [vmem:[%s2907_s4 + $0x90] ss:$12 sps:$4 sm:$0xff]   ;;  %v633_v55 = vsub.s32 0, %v2654_v54  ;;  %v641_v57 = vsub.s32 2, %v2654_v54 }
  0x34   : > { %557 = vadd.xlane.f32.xlu0 %v2541_v0  ;;  %2106 = vmatprep.subr.bf16.mxu1 %v2395_v4  ;;  %v2252_v26 = vld [vmem:[%s2907_s4 + $0x7c] ss:$12 sps:$4 sm:$0xff]   ;;  %v2255_v28 = vld [vmem:[%s2907_s4 + $0x80] ss:$12 sps:$4 sm:$0xff]   ;;  %v2259_v32 = vld [vmem:[%s2907_s4 + $0x98] ss:$12 sps:$4 sm:$0xff]  }
  0x35   : > { %v2256_v29 = vld [vmem:[%s2907_s4 + $0x94] ss:$12 sps:$4 sm:$0xff]   ;;  %v2260_v33 = vld [vmem:[%s2907_s4 + $0xac] ss:$12 sps:$4 sm:$0xff]   ;;  %v2263_v35 = vld [vmem:[%s2907_s4 + $0xb0] ss:$12 sps:$4 sm:$0xff]  }
  0x36   : > { %779 = vmatpush1.bf16.msra.mxu0 %v2242_v18  ;;  %v2262_v34 = vld [vmem:[%s2907_s4 + $0xa8] ss:$12 sps:$4 sm:$0xff]   ;;  %v1963_v44 = vld [vmem:[%s2905_s2] ss:$0 sm:$0xff]  ;;  %v637_v58 = vsub.s32 1, %v2654_v54  ;;  %vm869_vm1 = vcmask 261120  }
  0x37   : > { %2107 = vmatpush3.bf16.msra.mxu1 %v2243_v19  ;;  %780 = vmatprep.subr.bf16.mxu0 %v2244_v20  ;;  %v1964_v48 = vld [vmem:[%s2906_s3] ss:$0 sm:$0xff]  ;;  %vm917_vm2 = vcmask 130048   ;;  %s2398_s28 = smov 96   ;;  %s2399_s29 = smov 64   ;;  %vm1377_vm3 = vcmask 523264  }
  0x38   : > { %559 = vadd.xlane.f32.xlu0 %v2543_v1  ;;  %2108 = vmatprep.subr.bf16.mxu1 %v2395_v4  ;;  %v629_v56 = vld [vmem:[%s2908_s5] sm:$0x7]  ;;  %s2400_s30 = smov 32   ;;  %vm1380_vm4 = vcmask 785408  }
  0x39   : > { %v634_v59 = vrot.slane %v629_v56, %v633_v55  ;;  %v642_v60 = vrot.slane %v629_v56, %v641_v57  ;;  %v638_v63 = vrot.slane %v629_v56, %v637_v58  ;;  %v2025_v54 = vld [vmem:[%s2916_s13] ss:$0 sm:$0xff] }
  0x3a   : > { %781 = vmatpush1.bf16.msra.mxu0 %v2246_v21  ;;  %v2679_v21 = vld [vmem:[%s545_s27] ss:$0 sm:$0xff] }
  0x3b   : > { %2109 = vmatpush3.bf16.msra.mxu1 %v2247_v22  ;;  %782 = vmatprep.subr.bf16.mxu0 %v2248_v23 }
  0x3c   : > { %2110 = vmatprep.subr.bf16.mxu1 %v2395_v4 }
  0x3e   : > { %783 = vmatpush1.bf16.msra.mxu0 %v2250_v24 }
  0x3f   : > { %2111 = vmatpush3.bf16.msra.mxu1 %v2251_v25  ;;  %784 = vmatprep.subr.bf16.mxu0 %v2252_v26 }
  0x40   : > { %2112 = vmatprep.subr.bf16.mxu1 %v2395_v4 }
  0x42   : > { %785 = vmatpush1.bf16.msra.mxu0 %v2254_v27 }
  0x43   : > { %2113 = vmatpush3.bf16.msra.mxu1 %v2255_v28  ;;  %786 = vmatprep.subr.bf16.mxu0 %v2256_v29 }
  0x44   : > { %2114 = vmatprep.subr.bf16.mxu1 %v2395_v4 }
  0x46   : > { %787 = vmatpush1.bf16.msra.mxu0 %v2258_v31 }
  0x47   : > { %2115 = vmatpush3.bf16.msra.mxu1 %v2259_v32  ;;  %788 = vmatprep.subr.bf16.mxu0 %v2260_v33 }
  0x48   : > { %2116 = vmatprep.subr.bf16.mxu1 %v2395_v4 }
  0x4a   : > { %789 = vmatpush1.bf16.msra.mxu0 %v2262_v34 }
  0x4b   : > { %2117 = vmatpush3.bf16.msra.mxu1 %v2263_v35  ;;  %2146 = vmatprep.subr.bf16.mxu0 %v2395_v4 }
  0x4c   : > { %2122 = vmatprep.subr.bf16.mxu1 %v2395_v4 }
  0xc1   : > { %v558_v7 = vpop.xlane.xlu0 %557 }
  0xc2   : > { %v562_v8 = vmul.f32 0.0078125, %v558_v7 }
  0xc4   : > { %v2562_v9 = vsub.f32 %v2541_v0, %v562_v8 }
  0xc5   : > { %v560_v10 = vpop.xlane.xlu0 %559 }
  0xc6   : > { %v563_v11 = vmul.f32 0.0078125, %v560_v10  ;;  %v566_v12 = vmul.f32 %v2562_v9, %v2562_v9 }
  0xc8   : > { %v2567_v13 = vsub.f32 %v2543_v1, %v563_v11  ;;  %568 = vadd.xlane.f32.xlu1 %v566_v12 }
  0xca   : > { %v567_v14 = vmul.f32 %v2567_v13, %v2567_v13 }
  0xcc   : > { %570 = vadd.xlane.f32.xlu1 %v567_v14 }
 0x155   : > { %v569_v36 = vpop.xlane.xlu1 %568 }
 0x156   : > { %v572_v37 = vmul.f32 0.0078125, %v569_v36 }
 0x158   : > { %v574_v38 = vadd.f32 1e-05, %v572_v37 }
 0x159   : > { %v571_v39 = vpop.xlane.xlu1 %570 }
 0x15a   : > { %2312 = vrsqrt.f32 %v574_v38  ;;  %v573_v40 = vmul.f32 0.0078125, %v571_v39 }
 0x15c   : > { %v575_v41 = vadd.f32 1e-05, %v573_v40 }
 0x15e   : > { %2314 = vrsqrt.f32 %v575_v41 }
 0x164   : > { %v2313_v42 = vpop.eup %2312 }
 0x165   : > { %v578_v43 = vmul.f32 %v2313_v42, %v2562_v9 }
 0x167   : > { %v586_v47 = vmul.f32 %v1963_v44, %v578_v43 }
 0x168   : > { %v2315_v45 = vpop.eup %2314 }
 0x169   : > { %v579_v46 = vmul.f32 %v2315_v45, %v2567_v13  ;;  %v594_v50 = vadd.f32 %v1964_v48, %v586_v47 }
 0x16b   : > { %v587_v49 = vmul.f32 %v1963_v44, %v579_v46 }
 0x16d   : > { %v595_v51 = vadd.f32 %v1964_v48, %v587_v49 }
 0x16f   : > { %v596_v52 = vpack.c.bf16 %v595_v51, %v594_v50 }
 0x171   : > { %807 = vmatmul.mubr.bf16.vlgmr.msra.gmra.mrb[0].mxu0 %v596_v52  ;;  %2119 = vmatmul.mubr.bf16.vlgmr.msra.gmra.mrb[0].mxu1 %v596_v52 }
 0x172   : > { %2124 = vmatprep.mubr.msk.bf16.mxu1 %vm2397_vm0, %v2395_v4  ;;  %2148 = vmatprep.mubr.msk.bf16.mxu0 %vm2397_vm0, %v2395_v4 }
 0x244   : > { %v808_v61 = vpop.f32.mrb[0].mxu0  ;;  %v851_v62 = vpop.f32.mrb[0].mxu1 }
 0x245   : > { %v809_v2 = vadd.f32 %v808_v61, %v634_v59  ;;  %v810_v3 = vpop.f32.mrb[1].mxu0  ;;  %v2120_v5 = vpop.f32.mrb[1].mxu1  ;;  %v852_v8 = vadd.f32 %v851_v62, %v642_v60 }
 0x246   : > { %v812_v6 = vpop.f32.mrb[2].mxu0  ;;  %v854_v7 = vpop.f32.mrb[2].mxu1  ;;  %v811_v13 = vadd.f32 %v810_v3, %v638_v63 }
 0x247   : > { %v813_v9 = vadd.f32 %v812_v6, %v634_v59  ;;  %v855_v10 = vadd.f32 %v854_v7, %v642_v60  ;;  %v814_v11 = vpop.f32.mrb[3].mxu0  ;;  %v2121_v12 = vpop.f32.mrb[3].mxu1  ;;  %v858_v15 = vmul.f32 0.17677669, %v809_v2 }
 0x248   : > { %v815_v14 = vadd.f32 %v814_v11, %v638_v63 }
 0x249   : > { %v859_v16 = vmul.f32 0.17677669, %v813_v9  ;;  %v2666_v17 = vpack.c.bf16 %v855_v10, %v852_v8 }
 0x24a   : > { %v861_v18 = vpack.c.bf16 %v815_v14, %v811_v13 }
 0x24b   : > { %v860_v19 = vpack.c.bf16 %v859_v16, %v858_v15 }
 0x24c   : > { %v874_v20 = vsel %vm869_vm1, %v861_v18, 0 }
 0x24d   : > { %2123 = vmatpush3.bf16.xpose.msra.mxu1 %v874_v20 }
 0x24e   : > { %2128 = vmatprep.subr.bf16.mxu1 %v2395_v4 }
 0x254   : > { %2125 = vmatmul.mubr.msk.bf16.vlgmr.msra.gmra.mrb[4].mxu1 %vm869_vm1, %v860_v19 }
 0x255   : > { %2129 = vmatpush3.bf16.msra.mxu1 %v2666_v17  ;;  %2130 = vmatprep.mubr.msk.bf16.mxu1 %vm2397_vm0, %v2395_v4 }
 0x256   : > { %2134 = vmatprep.subr.bf16.mxu1 %v2395_v4 }
 0x327   : > { %v910_v22 = vpop.f32.mrb[4].mxu1 }
 0x328   : > { %v911_v23 = vadd.f32 %v2679_v21, %v910_v22  ;;  %v2126_v24 = vpop.f32.mrb[5].mxu1 }
 0x329   : > { %v913_v25 = vpop.f32.mrb[6].mxu1 }
 0x32a   : > { %v914_v26 = vadd.f32 %v2679_v21, %v913_v25  ;;  %v2127_v27 = vpop.f32.mrb[7].mxu1  ;;  %v918_v28 = vsel %vm917_vm2, %v911_v23, -inf }
 0x32b   : > { %919 = vmax.xlane.f32.xlu0 %v918_v28 }
 0x32c   : > { %v921_v29 = vsel %vm917_vm2, %v914_v26, -inf }
 0x32d   : > { %922 = vmax.xlane.f32.xlu1 %v921_v29 }
 0x3b8   : > { %v920_v31 = vpop.xlane.xlu0 %919 }
 0x3b9   : > { %v924_v32 = vsub.f32 %v911_v23, %v920_v31 }
 0x3ba   : > { %v923_v33 = vpop.xlane.xlu1 %922 }
 0x3bb   : > { %v926_v34 = vmul.f32 1.442695, %v924_v32  ;;  %v925_v35 = vsub.f32 %v914_v26, %v923_v33 }
 0x3bd   : > { %2316 = vpow2.f32 %v926_v34  ;;  %v928_v36 = vmul.f32 1.442695, %v925_v35 }
 0x3bf   : > { %2318 = vpow2.f32 %v928_v36 }
 0x3c7   : > { %v2317_v37 = vpop.eup %2316 }
 0x3c8   : > { %v930_v38 = vsel %vm917_vm2, %v2317_v37, 0.0 }
 0x3c9   : > { %v2319_v39 = vpop.eup %2318  ;;  %931 = vadd.xlane.f32.xlu0 %v930_v38 }
 0x3ca   : > { %v933_v40 = vsel %vm917_vm2, %v2319_v39, 0.0 }
 0x3cb   : > { %934 = vadd.xlane.f32.xlu1 %v933_v40 }
 0x3dc   : > { %986 = vrot.lane.b32.xlu1 %v860_v19, %s2398_s28 }
 0x3df   : > { %989 = vrot.lane.b32.xlu0 %v861_v18, %s2398_s28 }
 0x3e0   : > { %1111 = vrot.lane.b32.xlu1 %v861_v18, %s2399_s29 }
 0x3e3   : > { %1232 = vrot.lane.b32.xlu0 %v861_v18, %s2400_s30 }
 0x3e4   : > { %1109 = vrot.lane.b32.xlu1 %v860_v19, %s2399_s29 }
 0x3e8   : > { %1230 = vrot.lane.b32.xlu1 %v860_v19, %s2400_s30 }
 0x456   : > { %v932_v41 = vpop.xlane.xlu0 %931 }
 0x457   : > { %2320 = vrcp.f32 %v932_v41 }
 0x458   : > { %v935_v42 = vpop.xlane.xlu1 %934 }
 0x459   : > { %2322 = vrcp.f32 %v935_v42 }
 0x45a   : > { %v990_v44 = vpop.permute.xlu0 %989 }
 0x45b   : > { %v995_v53 = vsel %vm869_vm1, %v990_v44, 0 }
 0x45c   : > { %v987_v43 = vpop.permute.xlu1 %986 }
 0x45e   : > { %v1233_v51 = vpop.permute.xlu0 %1232 }
 0x45f   : > { %v1238_v57 = vsel %vm869_vm1, %v1233_v51, 0 }
 0x460   : > { %v1112_v45 = vpop.permute.xlu1 %1111 }
 0x461   : > { %v2321_v46 = vpop.eup %2320  ;;  %v1117_v47 = vsel %vm869_vm1, %v1112_v45, 0 }
 0x462   : > { %2147 = vmatpush3.bf16.xpose.msra.mxu0 %v1117_v47  ;;  %v938_v49 = vmul.f32 %v2321_v46, %v2317_v37 }
 0x463   : > { %v2323_v48 = vpop.eup %2322  ;;  %2158 = vmatprep.subr.bf16.mxu0 %v2395_v4 }
 0x464   : > { %v939_v50 = vmul.f32 %v2323_v48, %v2319_v39  ;;  %v1110_v56 = vpop.permute.xlu1 %1109 }
 0x466   : > { %v940_v52 = vpack.c.bf16 %v939_v50, %v938_v49 }
 0x468   : > { %2131 = vmatmul.mubr.msk.bf16.vlgmr.msra.gmra.mrb[8].mxu1 %vm917_vm2, %v940_v52  ;;  %v1231_v59 = vpop.permute.xlu1 %1230 }
 0x469   : > { %2135 = vmatpush3.bf16.xpose.msra.mxu1 %v995_v53  ;;  %2149 = vmatmul.mubr.msk.bf16.vlgmr.msra.gmra.mrb[4].mxu0 %vm869_vm1, %v1110_v56 }
 0x46a   : > { %2159 = vmatpush3.bf16.xpose.msra.mxu0 %v1238_v57  ;;  %2136 = vmatprep.mubr.msk.bf16.mxu1 %vm2397_vm0, %v2395_v4 }
 0x46b   : > { %2160 = vmatprep.mubr.msk.bf16.mxu0 %vm2397_vm0, %v2395_v4  ;;  %2140 = vmatprep.subr.bf16.mxu1 %v2395_v4 }
 0x46c   : > { %2170 = vmatprep.subr.bf16.mxu0 %v2395_v4 }
 0x470   : > { %2137 = vmatmul.mubr.msk.bf16.vlgmr.msra.gmra.mrb[12].mxu1 %vm869_vm1, %v987_v43 }
 0x471   : > { %2161 = vmatmul.mubr.msk.bf16.vlgmr.msra.gmra.mrb[8].mxu0 %vm869_vm1, %v1231_v59  ;;  %2142 = vmatprep.mubr.msk.bf16.mxu1 %vm2397_vm0, %v2395_v4 }
 0x472   : > { %2186 = vmatprep.mubr.msk.bf16.mxu0 %vm2397_vm0, %v2395_v4 }
 0x53b   : > { %v2711_v60 = vpop.f32.mrb[8].mxu1 }
 0x53c   : > { %v2132_v61 = vpop.f32.mrb[9].mxu1  ;;  %v1153_v62 = vpop.f32.mrb[4].mxu0 }
 0x53d   : > { %v2713_v63 = vpop.f32.mrb[10].mxu1  ;;  %v2150_v2 = vpop.f32.mrb[5].mxu0  ;;  %v1154_v13 = vadd.f32 %v2679_v21, %v1153_v62 }
 0x53e   : > { %v2133_v3 = vpop.f32.mrb[11].mxu1  ;;  %v1156_v5 = vpop.f32.mrb[6].mxu0 }
 0x53f   : > { %v2151_v6 = vpop.f32.mrb[7].mxu0  ;;  %v1157_v23 = vadd.f32 %v2679_v21, %v1156_v5  ;;  %v1160_v24 = vsel %vm917_vm2, %v1154_v13, -inf }
 0x541   : > { %v1163_v27 = vsel %vm917_vm2, %v1157_v23, -inf }
 0x543   : > { %v1031_v7 = vpop.f32.mrb[12].mxu1 }
 0x544   : > { %v1032_v8 = vadd.f32 %v2679_v21, %v1031_v7  ;;  %v2138_v9 = vpop.f32.mrb[13].mxu1  ;;  %v1274_v10 = vpop.f32.mrb[8].mxu0 }
 0x545   : > { %v1034_v11 = vpop.f32.mrb[14].mxu1  ;;  %v2162_v12 = vpop.f32.mrb[9].mxu0  ;;  %v1275_v26 = vadd.f32 %v2679_v21, %v1274_v10 }
 0x546   : > { %v1035_v14 = vadd.f32 %v2679_v21, %v1034_v11  ;;  %v2139_v15 = vpop.f32.mrb[15].mxu1  ;;  %v1277_v16 = vpop.f32.mrb[10].mxu0  ;;  %v1038_v18 = vsel %vm917_vm2, %v1032_v8, -inf }
 0x547   : > { %v2163_v19 = vpop.f32.mrb[11].mxu0  ;;  %1039 = vmax.xlane.f32.xlu0 %v1038_v18  ;;  %v1278_v20 = vadd.f32 %v2679_v21, %v1277_v16  ;;  %v1281_v28 = vsel %vm917_vm2, %v1275_v26, -inf }
 0x548   : > { %v1041_v22 = vsel %vm917_vm2, %v1035_v14, -inf }
 0x549   : > { %1042 = vmax.xlane.f32.xlu1 %v1041_v22  ;;  %v1284_v25 = vsel %vm917_vm2, %v1278_v20, -inf }
 0x54b   : > { %1161 = vmax.xlane.f32.xlu0 %v1160_v24 }
 0x54d   : > { %1285 = vmax.xlane.f32.xlu1 %v1284_v25 }
 0x54f   : > { %1164 = vmax.xlane.f32.xlu0 %v1163_v27 }
 0x553   : > { %1282 = vmax.xlane.f32.xlu0 %v1281_v28  ;;  %v2264_v28 = vld [vmem:[#allocation2] sm:$0xff]  }
 0x554   : > { %2171 = vmatpush3.bf16.msra.mxu0 %v2264_v28  ;;  %v2278_v28 = vld [vmem:[%s2913_s10 + $0x20] ss:$8 sps:$4 sm:$0xff]  }
 0x555   : > { %2172 = vmatprep.subr.bf16.mxu0 %v2395_v4 }
 0x5d4   : > { %v1040_v29 = vpop.xlane.xlu0 %1039 }
 0x5d5   : > { %v1044_v39 = vsub.f32 %v1032_v8, %v1040_v29  ;;  %v2265_v29 = vld [vmem:[#allocation2 + $0x8] sm:$0xff]  }
 0x5d6   : > { %v1043_v31 = vpop.xlane.xlu1 %1042  ;;  %2173 = vmatpush3.bf16.msra.mxu0 %v2265_v29  ;;  %v2283_v29 = vld [vmem:[%s2913_s10 + $0x34] ss:$8 sps:$4 sm:$0xff]  }
 0x5d7   : > { %v1045_v40 = vsub.f32 %v1035_v14, %v1043_v31  ;;  %v1046_v44 = vmul.f32 1.442695, %v1044_v39  ;;  %v2266_v31 = vld [vmem:[#allocation2 + $0x10] sm:$0xff]   ;;  %2174 = vmatprep.subr.bf16.mxu0 %v2395_v4 }
 0x5d8   : > { %v1162_v32 = vpop.xlane.xlu0 %1161  ;;  %v2270_v39 = vld [vmem:[#allocation2 + $0x30] sm:$0xff]  }
 0x5d9   : > { %v1166_v33 = vsub.f32 %v1154_v13, %v1162_v32  ;;  %v1048_v45 = vmul.f32 1.442695, %v1045_v40  ;;  %v2267_v32 = vld [vmem:[#allocation2 + $0x18] sm:$0xff]  }
 0x5da   : > { %v1286_v34 = vpop.xlane.xlu1 %1285  ;;  %2175 = vmatpush3.bf16.msra.mxu0 %v2266_v31  ;;  %v2281_v31 = vld [vmem:[%s2913_s10 + $0x30] ss:$8 sps:$4 sm:$0xff]  }
 0x5db   : > { %v1168_v35 = vmul.f32 1.442695, %v1166_v33  ;;  %v1288_v36 = vsub.f32 %v1278_v20, %v1286_v34  ;;  %2176 = vmatprep.subr.bf16.mxu0 %v2395_v4  ;;  %v2268_v33 = vld [vmem:[#allocation2 + $0x20] sm:$0xff]  }
 0x5dc   : > { %v1165_v37 = vpop.xlane.xlu0 %1164 }
 0x5dd   : > { %2324 = vpow2.f32 %v1168_v35  ;;  %v1167_v38 = vsub.f32 %v1157_v23, %v1165_v37  ;;  %v1291_v41 = vmul.f32 1.442695, %v1288_v36  ;;  %v2269_v35 = vld [vmem:[#allocation2 + $0x28] sm:$0xff]  }
 0x5de   : > { %2177 = vmatpush3.bf16.msra.mxu0 %v2267_v32  ;;  %v2286_v32 = vld [vmem:[%s2913_s10 + $0x44] ss:$8 sps:$4 sm:$0xff]  }
 0x5df   : > { %v1170_v21 = vmul.f32 1.442695, %v1167_v38  ;;  %2178 = vmatprep.subr.bf16.mxu0 %v2395_v4 }
 0x5e0   : > { %v1283_v42 = vpop.xlane.xlu0 %1282 }
 0x5e1   : > { %2326 = vpow2.f32 %v1170_v21  ;;  %v1287_v43 = vsub.f32 %v1275_v26, %v1283_v42  ;;  %v2271_v21 = vld [vmem:[#allocation2 + $0x38] sm:$0xff]  }
 0x5e2   : > { %2328 = vpow2.f32 %v1291_v41  ;;  %2179 = vmatpush3.bf16.msra.mxu0 %v2268_v33  ;;  %v2284_v33 = vld [vmem:[%s2913_s10 + $0x40] ss:$8 sps:$4 sm:$0xff]  }
 0x5e3   : > { %v1289_v46 = vmul.f32 1.442695, %v1287_v43  ;;  %2180 = vmatprep.subr.bf16.mxu0 %v2395_v4 }
 0x5e5   : > { %2330 = vpow2.f32 %v1289_v46 }
 0x5e6   : > { %2332 = vpow2.f32 %v1046_v44  ;;  %2181 = vmatpush3.bf16.msra.mxu0 %v2269_v35  ;;  %v2292_v35 = vld [vmem:[%s2913_s10 + $0x64] ss:$8 sps:$4 sm:$0xff]  }
 0x5e7   : > { %v2325_v47 = vpop.eup %2324  ;;  %2334 = vpow2.f32 %v1048_v45  ;;  %2182 = vmatprep.subr.bf16.mxu0 %v2395_v4 }
 0x5e8   : > { %v1172_v48 = vsel %vm917_vm2, %v2325_v47, 0.0 }
 0x5e9   : > { %1173 = vadd.xlane.f32.xlu0 %v1172_v48 }
 0x5ea   : > { %2183 = vmatpush3.bf16.msra.mxu0 %v2270_v39  ;;  %v2296_v39 = vld [vmem:[%s2915_s12 + $0x40] sm:$0xff]  }
 0x5eb   : > { %v2327_v49 = vpop.eup %2326  ;;  %2184 = vmatprep.subr.bf16.mxu0 %v2395_v4 }
 0x5ec   : > { %v1175_v50 = vsel %vm917_vm2, %v2327_v49, 0.0  ;;  %v2329_v51 = vpop.eup %2328 }
 0x5ed   : > { %1176 = vadd.xlane.f32.xlu1 %v1175_v50  ;;  %v1296_v57 = vsel %vm917_vm2, %v2329_v51, 0.0 }
 0x5ee   : > { %2185 = vmatpush3.bf16.msra.mxu0 %v2271_v21  ;;  %v2299_v21 = vld [vmem:[%s2915_s12 + $0x8] sm:$0xff]  }
 0x5ef   : > { %v2331_v52 = vpop.eup %2330  ;;  %2080 = vmatprep.subr.bf16.mxu0 %v2296_v39 }
 0x5f0   : > { %v2333_v53 = vpop.eup %2332  ;;  %v1293_v56 = vsel %vm917_vm2, %v2331_v52, 0.0 }
 0x5f1   : > { %v2335_v59 = vpop.eup %2334  ;;  %1294 = vadd.xlane.f32.xlu0 %v1293_v56  ;;  %1297 = vadd.xlane.f32.xlu1 %v1296_v57  ;;  %v1050_v61 = vsel %vm917_vm2, %v2333_v53, 0.0 }
 0x5f2   : > { %v1053_v62 = vsel %vm917_vm2, %v2335_v59, 0.0 }
 0x5f5   : > { %1051 = vadd.xlane.f32.xlu0 %v1050_v61  ;;  %1054 = vadd.xlane.f32.xlu1 %v1053_v62 }
 0x606   : > { %1183 = vrot.lane.b32.xlu1 %v2666_v17, %s2399_s29 }
 0x60a   : > { %1304 = vrot.lane.b32.xlu1 %v2666_v17, %s2400_s30 }
 0x60b   : > { %1062 = vrot.lane.b32.xlu0 %v2666_v17, %s2398_s28 }
 0x676   : > { %v1174_v2 = vpop.xlane.xlu0 %1173 }
 0x67a   : > { %v1177_v3 = vpop.xlane.xlu1 %1176 }
 0x67e   : > { %v1295_v5 = vpop.xlane.xlu0 %1294  ;;  %v1298_v6 = vpop.xlane.xlu1 %1297 }
 0x682   : > { %v1052_v7 = vpop.xlane.xlu0 %1051  ;;  %v1055_v8 = vpop.xlane.xlu1 %1054 }
 0x683   : > { %2336 = vrcp.f32 %v1052_v7 }
 0x684   : > { %2338 = vrcp.f32 %v1055_v8 }
 0x685   : > { %2340 = vrcp.f32 %v1177_v3 }
 0x686   : > { %v1063_v9 = vpop.permute.xlu0 %1062  ;;  %2342 = vrcp.f32 %v1174_v2  ;;  %v1184_v15 = vpop.permute.xlu1 %1183 }
 0x687   : > { %2141 = vmatpush3.bf16.msra.mxu1 %v1063_v9  ;;  %2344 = vrcp.f32 %v1295_v5  ;;  %v1998_v9 = vld [vmem:[%s2910_s7] ss:$0 sm:$0xff] }
 0x688   : > { %2152 = vmatprep.subr.bf16.mxu1 %v2395_v4  ;;  %2346 = vrcp.f32 %v1298_v6 }
 0x68a   : > { %v1305_v24 = vpop.permute.xlu1 %1304 }
 0x68d   : > { %v2337_v10 = vpop.eup %2336 }
 0x68e   : > { %v2339_v11 = vpop.eup %2338  ;;  %v1058_v12 = vmul.f32 %v2337_v10, %v2333_v53 }
 0x68f   : > { %v1059_v13 = vmul.f32 %v2339_v11, %v2335_v59  ;;  %v2341_v14 = vpop.eup %2340 }
 0x690   : > { %v2343_v16 = vpop.eup %2342  ;;  %v1181_v18 = vmul.f32 %v2341_v14, %v2327_v49 }
 0x691   : > { %v1060_v17 = vpack.c.bf16 %v1059_v13, %v1058_v12  ;;  %v1180_v19 = vmul.f32 %v2343_v16, %v2325_v47  ;;  %v2345_v20 = vpop.eup %2344  ;;  %v2274_v16 = vld [vmem:[%s2913_s10 + $0x4] ss:$8 sps:$4 sm:$0xff]  }
 0x692   : > { %v2347_v23 = vpop.eup %2346  ;;  %v1301_v25 = vmul.f32 %v2345_v20, %v2331_v52 }
 0x693   : > { %2143 = vmatmul.mubr.msk.bf16.vlgmr.msra.gmra.mrb[16].mxu1 %vm917_vm2, %v1060_v17  ;;  %v1182_v22 = vpack.c.bf16 %v1181_v18, %v1180_v19  ;;  %v1302_v26 = vmul.f32 %v2347_v23, %v2329_v51 }
 0x694   : > { %2153 = vmatpush3.bf16.msra.mxu1 %v1184_v15  ;;  %2154 = vmatprep.mubr.msk.bf16.mxu1 %vm2397_vm0, %v2395_v4  ;;  %v2272_v15 = vld [vmem:[%s2913_s10] ss:$8 sps:$4 sm:$0xff]  }
 0x695   : > { %2164 = vmatprep.subr.bf16.mxu1 %v2395_v4  ;;  %v1303_v27 = vpack.c.bf16 %v1302_v26, %v1301_v25 }
 0x69b   : > { %2155 = vmatmul.mubr.msk.bf16.vlgmr.msra.gmra.mrb[20].mxu1 %vm917_vm2, %v1182_v22 }
 0x69c   : > { %2165 = vmatpush3.bf16.msra.mxu1 %v1305_v24  ;;  %2166 = vmatprep.mubr.msk.bf16.mxu1 %vm2397_vm0, %v2395_v4 }
 0x69d   : > { %1647 = vmatprep.subr.bf16.mxu1 %v2274_v16 }
 0x6a3   : > { %2167 = vmatmul.mubr.msk.bf16.vlgmr.msra.gmra.mrb[24].mxu1 %vm917_vm2, %v1303_v27  ;;  %v2280_v27 = vld [vmem:[%s2913_s10 + $0x24] ss:$8 sps:$4 sm:$0xff]  }
 0x6a4   : > { %1679 = vmatprep.mubr.bf16.mxu1 %v2396_v30  ;;  %1648 = vmatpush1.bf16.msra.mxu1 %v2272_v15 }
 0x766   : > { %v1102_v34 = vpop.f32.mrb[16].mxu1 }
 0x767   : > { %v2144_v30 = vpop.f32.mrb[17].mxu1 }
 0x768   : > { %v1105_v36 = vpop.f32.mrb[18].mxu1  ;;  %v2287_v30 = vld [vmem:[%s2913_s10 + $0x50] ss:$8 sps:$4 sm:$0xff]  }
 0x769   : > { %v2217_v37 = vpack.i.bf16 %v1105_v36, %v1102_v34  ;;  %v2145_v38 = vpop.f32.mrb[19].mxu1  ;;  %v2289_v34 = vld [vmem:[%s2913_s10 + $0x54] ss:$8 sps:$4 sm:$0xff]   ;;  %v2290_v36 = vld [vmem:[%s2913_s10 + $0x60] ss:$8 sps:$4 sm:$0xff]  }
 0x76a   : > { %v2293_v38 = vld [vmem:[%s2913_s10 + $0x70] ss:$8 sps:$4 sm:$0xff]  }
 0x76b   : > { %2218 = vrot.lane.b32.xlu1 %v2217_v37, %s2400_s30  ;;  %v2295_v37 = vld [vmem:[%s2913_s10 + $0x74] ss:$8 sps:$4 sm:$0xff]  }
 0x76e   : > { %v1223_v40 = vpop.f32.mrb[20].mxu1 }
 0x76f   : > { %v2156_v41 = vpop.f32.mrb[21].mxu1 }
 0x770   : > { %v1226_v42 = vpop.f32.mrb[22].mxu1  ;;  %v2298_v41 = vld [vmem:[%s2915_s12 + $0x48] sm:$0xff]  }
 0x771   : > { %v2222_v43 = vpack.i.bf16 %v1226_v42, %v1223_v40  ;;  %v2157_v44 = vpop.f32.mrb[23].mxu1  ;;  %v2297_v40 = vld [vmem:[%s2915_s12] sm:$0xff]   ;;  %v2300_v42 = vld [vmem:[%s2915_s12 + $0x50] sm:$0xff]  }
 0x772   : > { %v2302_v44 = vld [vmem:[%s2915_s12 + $0x58] sm:$0xff]  }
 0x773   : > { %2223 = vrot.lane.b32.xlu0 %v2222_v43, %s2399_s29  ;;  %v2301_v43 = vld [vmem:[%s2915_s12 + $0x10] sm:$0xff]  }
 0x776   : > { %v1344_v45 = vpop.f32.mrb[24].mxu1 }
 0x777   : > { %v2168_v46 = vpop.f32.mrb[25].mxu1 }
 0x778   : > { %v1347_v47 = vpop.f32.mrb[26].mxu1  ;;  %v2304_v46 = vld [vmem:[%s2915_s12 + $0x60] sm:$0xff]  }
 0x779   : > { %v2227_v48 = vpack.i.bf16 %v1347_v47, %v1344_v45  ;;  %v2169_v49 = vpop.f32.mrb[27].mxu1  ;;  %v2303_v45 = vld [vmem:[%s2915_s12 + $0x18] sm:$0xff]   ;;  %v2305_v47 = vld [vmem:[%s2915_s12 + $0x20] sm:$0xff]  }
 0x77b   : > { %2228 = vrot.lane.b32.xlu1 %v2227_v48, %s2398_s28  ;;  %v2306_v48 = vld [vmem:[%s2915_s12 + $0x68] sm:$0xff]  }
 0x7dd   : > { %v2219_v50 = vpop.permute.xlu1 %2218 }
 0x7de   : > { %v2221_v52 = vunpack.i.h.bf16 %v2219_v50  ;;  %v2220_v53 = vunpack.i.l.bf16 %v2219_v50 }
 0x7e0   : > { %v1376_v59 = vsel %vm869_vm1, %v2713_v63, %v2221_v52  ;;  %v1375_v61 = vsel %vm869_vm1, %v2711_v60, %v2220_v53 }
 0x7e5   : > { %v2224_v51 = vpop.permute.xlu0 %2223 }
 0x7e6   : > { %v2226_v4 = vunpack.i.h.bf16 %v2224_v51  ;;  %v2225_v56 = vunpack.i.l.bf16 %v2224_v51 }
 0x7e8   : > { %v1379_v3 = vsel %vm1377_vm3, %v1376_v59, %v2226_v4  ;;  %v1378_v5 = vsel %vm1377_vm3, %v1375_v61, %v2225_v56  ;;  %v2007_v59 = vld [vmem:[%s2911_s8] ss:$0 sm:$0xff] }
 0x7ed   : > { %v2229_v57 = vpop.permute.xlu1 %2228 }
 0x7ee   : > { %v2231_v62 = vunpack.i.h.bf16 %v2229_v57  ;;  %v2230_v2 = vunpack.i.l.bf16 %v2229_v57 }
 0x7f0   : > { %v1382_v6 = vsel %vm1380_vm4, %v1379_v3, %v2231_v62  ;;  %v1381_v7 = vsel %vm1380_vm4, %v1378_v5, %v2230_v2  ;;  %v2008_v3 = vld [vmem:[%s2912_s9] ss:$0 sm:$0xff] }
 0x7f1   : > { %v1383_v8 = vpack.c.bf16 %v1382_v6, %v1381_v7 }
 0x7f3   : > { %2187 = vmatmul.mubr.bf16.vlgmr.msra.gmra.mrb[12].mxu0 %v1383_v8 }
 0x7f4   : > { %2081 = vmatpush3.bf16.msra.mxu0 %v2297_v40 }
 0x7f5   : > { %2082 = vmatprep.subr.bf16.mxu0 %v2298_v41 }
 0x7f8   : > { %2083 = vmatpush3.bf16.msra.mxu0 %v2299_v21 }
 0x7f9   : > { %2084 = vmatprep.subr.bf16.mxu0 %v2300_v42 }
 0x7fc   : > { %2085 = vmatpush3.bf16.msra.mxu0 %v2301_v43 }
 0x7fd   : > { %2086 = vmatprep.subr.bf16.mxu0 %v2302_v44 }
 0x800   : > { %2087 = vmatpush3.bf16.msra.mxu0 %v2303_v45 }
 0x801   : > { %2088 = vmatprep.subr.bf16.mxu0 %v2304_v46 }
 0x804   : > { %2089 = vmatpush3.bf16.msra.mxu0 %v2305_v47 }
 0x805   : > { %2090 = vmatprep.subr.bf16.mxu0 %v2306_v48 }
 0x8c6   : > { %v1489_v10 = vpop.f32.mrb[12].mxu0 }
 0x8c7   : > { %v1490_v11 = vadd.f32 %v1998_v9, %v1489_v10  ;;  %v2188_v12 = vpop.f32.mrb[13].mxu0  ;;  %v2308_v10 = vld [vmem:[%s2915_s12 + $0x70] sm:$0xff]  }
 0x8c8   : > { %v1492_v13 = vpop.f32.mrb[14].mxu0  ;;  %v2310_v12 = vld [vmem:[%s2915_s12 + $0x78] sm:$0xff]  }
 0x8c9   : > { %v2767_v63 = vadd.f32 %v1490_v11, %v2541_v0  ;;  %v1493_v60 = vadd.f32 %v1998_v9, %v1492_v13  ;;  %v2189_v17 = vpop.f32.mrb[15].mxu0  ;;  %v2277_v0 = vld [vmem:[%s2913_s10 + $0x14] ss:$8 sps:$4 sm:$0xff]   ;;  %v2307_v9 = vld [vmem:[%s2915_s12 + $0x28] sm:$0xff]  }
 0x8ca   : > { %1649 = vmatprep.subr.bf16.mxu1 %v2277_v0  ;;  %2091 = vmatpush3.bf16.msra.mxu0 %v2307_v9  ;;  %v2309_v11 = vld [vmem:[%s2915_s12 + $0x30] sm:$0xff]   ;;  %v2311_v13 = vld [vmem:[%s2915_s12 + $0x38] sm:$0xff]  }
 0x8cb   : > { %v2770_v14 = vadd.f32 %v1493_v60, %v2543_v1  ;;  %1500 = vadd.xlane.f32.xlu0 %v2767_v63  ;;  %v2275_v1 = vld [vmem:[%s2913_s10 + $0x10] ss:$8 sps:$4 sm:$0xff]   ;;  %2092 = vmatprep.subr.bf16.mxu0 %v2308_v10  ;;  %v1555_v60 = vld [vmem:[%s2914_s11] sm:$0x3] }
 0x8cc   : > { %1650 = vmatpush1.bf16.msra.mxu1 %v2275_v1  ;;  %v1560_v17 = vrot.slane %v1555_v60, %v633_v55  ;;  %v1564_v15 = vrot.slane %v1555_v60, %v637_v58 }
 0x8cd   : > { %1502 = vadd.xlane.f32.xlu1 %v2770_v14  ;;  %1651 = vmatprep.subr.bf16.mxu1 %v2280_v27 }
 0x8ce   : > { %2093 = vmatpush3.bf16.msra.mxu0 %v2309_v11 }
 0x8cf   : > { %2094 = vmatprep.subr.bf16.mxu0 %v2310_v12 }
 0x8d0   : > { %1652 = vmatpush1.bf16.msra.mxu1 %v2278_v28 }
 0x8d1   : > { %1653 = vmatprep.subr.bf16.mxu1 %v2283_v29 }
 0x8d2   : > { %2095 = vmatpush3.bf16.msra.mxu0 %v2311_v13 }
 0x8d4   : > { %1654 = vmatpush1.bf16.msra.mxu1 %v2281_v31 }
 0x8d5   : > { %1655 = vmatprep.subr.bf16.mxu1 %v2286_v32 }
 0x8d8   : > { %1656 = vmatpush1.bf16.msra.mxu1 %v2284_v33 }
 0x8d9   : > { %1657 = vmatprep.subr.bf16.mxu1 %v2289_v34 }
 0x8dc   : > { %1658 = vmatpush1.bf16.msra.mxu1 %v2287_v30 }
 0x8dd   : > { %1659 = vmatprep.subr.bf16.mxu1 %v2292_v35 }
 0x8e0   : > { %1660 = vmatpush1.bf16.msra.mxu1 %v2290_v36 }
 0x8e1   : > { %1661 = vmatprep.subr.bf16.mxu1 %v2295_v37 }
 0x8e4   : > { %1662 = vmatpush1.bf16.msra.mxu1 %v2293_v38 }
 0x958   : > { %v1501_v18 = vpop.xlane.xlu0 %1500 }
 0x959   : > { %v1504_v19 = vmul.f32 0.0078125, %v1501_v18 }
 0x95a   : > { %v1503_v20 = vpop.xlane.xlu1 %1502 }
 0x95b   : > { %v1506_v22 = vsub.f32 %v2767_v63, %v1504_v19  ;;  %v1505_v23 = vmul.f32 0.0078125, %v1503_v20 }
 0x95d   : > { %v2788_v24 = vsub.f32 %v2770_v14, %v1505_v23  ;;  %v1508_v25 = vmul.f32 %v1506_v22, %v1506_v22 }
 0x95f   : > { %1510 = vadd.xlane.f32.xlu0 %v1508_v25  ;;  %v1509_v26 = vmul.f32 %v2788_v24, %v2788_v24 }
 0x963   : > { %1512 = vadd.xlane.f32.xlu0 %v1509_v26 }
 0x9ec   : > { %v1511_v49 = vpop.xlane.xlu0 %1510 }
 0x9ed   : > { %v1514_v50 = vmul.f32 0.0078125, %v1511_v49 }
 0x9ef   : > { %v1516_v51 = vadd.f32 1e-05, %v1514_v50 }
 0x9f0   : > { %v1513_v52 = vpop.xlane.xlu0 %1512 }
 0x9f1   : > { %2348 = vrsqrt.f32 %v1516_v51  ;;  %v1515_v53 = vmul.f32 0.0078125, %v1513_v52 }
 0x9f3   : > { %v1517_v4 = vadd.f32 1e-05, %v1515_v53 }
 0x9f5   : > { %2350 = vrsqrt.f32 %v1517_v4 }
 0x9fb   : > { %v2349_v56 = vpop.eup %2348 }
 0x9fc   : > { %v1520_v57 = vmul.f32 %v2349_v56, %v1506_v22 }
 0x9fe   : > { %v1528_v2 = vmul.f32 %v2007_v59, %v1520_v57 }
 0x9ff   : > { %v2351_v61 = vpop.eup %2350 }
 0xa00   : > { %v1521_v62 = vmul.f32 %v2351_v61, %v2788_v24  ;;  %v1536_v6 = vadd.f32 %v2008_v3, %v1528_v2 }
 0xa02   : > { %v1529_v5 = vmul.f32 %v2007_v59, %v1521_v62 }
 0xa04   : > { %v1537_v7 = vadd.f32 %v2008_v3, %v1529_v5 }
 0xa06   : > { %v1538_v8 = vpack.c.bf16 %v1537_v7, %v1536_v6 }
 0xa08   : > { %1680 = vmatmul.mubr.bf16.vlgmr.msra.gmra.mrb[28].mxu1 %v1538_v8 }
 0xadb   : > { %v1681_v16 = vpop.f32.mrb[28].mxu1 }
 0xadc   : > { %v1682_v0 = vadd.f32 %v1681_v16, %v1560_v17  ;;  %v1683_v1 = vpop.f32.mrb[29].mxu1 }
 0xadd   : > { %v1684_v18 = vadd.f32 %v1683_v1, %v1564_v15  ;;  %v1685_v19 = vpop.f32.mrb[30].mxu1 }
 0xade   : > { %v1686_v20 = vadd.f32 %v1685_v19, %v1560_v17  ;;  %v1687_v22 = vpop.f32.mrb[31].mxu1  ;;  %v1690_v24 = vmax.f32 %v1682_v0, 0.0 }
 0xadf   : > { %v1688_v23 = vadd.f32 %v1687_v22, %v1564_v15  ;;  %v1691_v26 = vmax.f32 %v1684_v18, 0.0 }
 0xae0   : > { %v1692_v25 = vmax.f32 %v1686_v20, 0.0 }
 0xae1   : > { %v1693_v27 = vmax.f32 %v1688_v23, 0.0 }
 0xae2   : > { %v1694_v28 = vpack.c.bf16 %v1692_v25, %v1690_v24 }
 0xae3   : > { %v1695_v29 = vpack.c.bf16 %v1693_v27, %v1691_v26 }
 0xae5   : > { %1863 = vmatprep.mubr.bf16.mxu0 %v1695_v29 }
 0xae6   : > { %1864 = vmatmul.mubr.bf16.vlgmr.msra.gmra.mrb[16].mxu0 %v1694_v28 }
 0xbb9   : > { %v2096_v55 = vpop.f32.mrb[16].mxu0 }
 0xbba   : > { %v2097_v58 = vpop.f32.mrb[17].mxu0 }
 0xbbb   : > { %v2098_v31 = vadd.f32 %v2097_v58, %v2096_v55  ;;  %v2099_v32 = vpop.f32.mrb[18].mxu0 }
 0xbbc   : > { %v2100_v33 = vpop.f32.mrb[19].mxu0 }
 0xbbd   : > { %v1866_v34 = vadd.f32 %v2098_v31, %v2025_v54  ;;  %v2101_v30 = vadd.f32 %v2100_v33, %v2099_v32 }
 0xbbf   : > { %v1872_v35 = vadd.f32 %v1866_v34, %v2767_v63  ;;  %v1869_v36 = vadd.f32 %v2101_v30, %v2025_v54 }
 0xbc1   : > { %1874 = vst [vmem:[%s550_s25] sm:$0xff] %v1872_v35  ;;  %v1873_v37 = vadd.f32 %v1869_v36, %v2770_v14 }
 0xbc3   : > { %1875 = vst [vmem:[%s550_s25 + $0x8] sm:$0xff] %v1873_v37 }
 0xbc4 PF: > { %s27_s21 = sadd.s32 1, %s2390_s21  }
 0xbc5   : > { %p24_p3 = scmp.ge.s32.totalorder %s27_s21, 4  }
 0xbc7   :  { %26 = sbr.rel (!%p24_p3) target bundleno = 3 (0x3), region = 122 }
 0xbce   :  { %1897 = vsyncpa [#allocation3], 1 }
 0xbcf   :  { %1899 = vsyncpa [#allocation3 + $0x1], 1 }

// kernel: transformer_encoder_forward.3
= control target key start
LH: loop header
LB: loop body
LE: loop exit
PB: predicated region body
PF: predicated region fallthrough
CT: control target
= control target key end

     0   :  { %s2455_s21 = smov 0   ;;  %s2863_s0 = inlined_call_operand.vmem [shape: f32[2,16,128], index: 0, kind: input, shape index: {}]   ;;  %s2864_s1 = inlined_call_operand.vmem [shape: f32[2,1,16], index: 1, kind: input, shape index: {}]   ;;  %s2865_s2 = inlined_call_operand.vmem [shape: f32[1,128], index: 2, kind: input, shape index: {}]   ;;  %s2866_s3 = inlined_call_operand.vmem [shape: f32[1,128], index: 3, kind: input, shape index: {}]   ;;  %s2867_s4 = inlined_call_operand.vmem [shape: bf16[128,384], index: 4, kind: input, shape index: {}]   ;;  %s2868_s5 = inlined_call_operand.vmem [shape: f32[1,384], index: 5, kind: input, shape index: {}]   ;;  %s2869_s6 = inlined_call_operand.vmem [shape: bf16[128,128], index: 6, kind: input, shape index: {}]   ;;  %s2870_s7 = inlined_call_operand.vmem [shape: f32[1,128], index: 7, kind: input, shape index: {}]   ;;  %s2871_s8 = inlined_call_operand.vmem [shape: f32[1,128], index: 8, kind: input, shape index: {}]   ;;  %s2872_s9 = inlined_call_operand.vmem [shape: f32[1,128], index: 9, kind: input, shape index: {}]   ;;  %s2873_s10 = inlined_call_operand.vmem [shape: bf16[128,256], index: 10, kind: input, shape index: {}]   ;;  %s2874_s11 = inlined_call_operand.vmem [shape: f32[1,256], index: 11, kind: input, shape index: {}]   ;;  %s2875_s12 = inlined_call_operand.vmem [shape: bf16[256,128], index: 12, kind: input, shape index: {}]   ;;  %s2876_s13 = inlined_call_operand.vmem [shape: f32[1,128], index: 13, kind: input, shape index: {}]   ;;  %s2877_s14 = inlined_call_operand.vmem [shape: f32[1,128], index: 14, kind: input, shape index: {}]   ;;  %s2878_s15 = inlined_call_operand.vmem [shape: f32[1,128], index: 15, kind: input, shape index: {}]   ;;  %s2879_s16 = inlined_call_operand.vmem [shape: f32[2,16,128], index: 16, kind: output, shape index: {}]  }
   0x1   :  { %2880 = sst [smem:[#allocation2_spill]] %s2863_s0 }
   0x2 LB: > { %s1965_s22 = sadd.s32 4294967295, %s2362_s21   ;;  %p1969_p0 = scmp.ge.s32.totalorder %s2362_s21, 1  ;;  %s2362_s21 = sphi %s2455_s21, %s26_s21  }
   0x3   : > { %p470_p1 = scmp.lt.s32.totalorder %s2362_s21, 3 }
   0x5   : > { %p471_p2 = pnand %p1969_p0, %p470_p1 }
   0x6   : > { %p523_p3 = scmp.lt.s32.totalorder (!%p471_p2), %s1965_s22, 1  ;;  %s2881_s26 = sld [smem:[#allocation2_spill]] (!%p471_p2)  ;;  %v2232_v2 = vld [vmem:[%s2867_s4 + $0x4] ss:$12 sps:$4 sm:$0xff] (!%p471_p2)   ;;  %v2234_v3 = vld [vmem:[%s2867_s4] ss:$12 sps:$4 sm:$0xff] (!%p471_p2)   ;;  %v616_v53 = vlaneseq (!%p471_p2) }
   0x7   : > { %474 = sbr.rel (%p471_p2) target bundleno = 3289 (0xcd9), region = 84  ;;  %v2364_v4 = vmov (!%p471_p2), 0.0   ;;  %v2235_v5 = vld [vmem:[%s2867_s4 + $0x8] ss:$12 sps:$4 sm:$0xff] (!%p471_p2)   ;;  %759 = vmatprep.subr.bf16.mxu0 (!%p471_p2), %v2232_v2  ;;  %v2238_v15 = vld [vmem:[%s2867_s4 + $0x18] ss:$12 sps:$4 sm:$0xff] (!%p471_p2)  }
   0x8   : > { %2115 = vmatprep.subr.bf16.mxu1 (!%p471_p2), %v2364_v4  ;;  %v2236_v6 = vld [vmem:[%s2867_s4 + $0x1c] ss:$12 sps:$4 sm:$0xff] (!%p471_p2)   ;;  %760 = vmatpush1.bf16.msra.mxu0 (!%p471_p2), %v2234_v3  ;;  %v2239_v16 = vld [vmem:[%s2867_s4 + $0x20] ss:$12 sps:$4 sm:$0xff] (!%p471_p2)   ;;  %v2243_v19 = vld [vmem:[%s2867_s4 + $0x38] ss:$12 sps:$4 sm:$0xff] (!%p471_p2)  }
   0x9   : > { %2116 = vmatpush3.bf16.msra.mxu1 (!%p471_p2), %v2235_v5  ;;  %761 = vmatprep.subr.bf16.mxu0 (!%p471_p2), %v2236_v6  ;;  %v2240_v17 = vld [vmem:[%s2867_s4 + $0x34] ss:$12 sps:$4 sm:$0xff] (!%p471_p2)   ;;  %v2242_v18 = vld [vmem:[%s2867_s4 + $0x30] ss:$12 sps:$4 sm:$0xff] (!%p471_p2)   ;;  %v2244_v20 = vld [vmem:[%s2867_s4 + $0x4c] ss:$12 sps:$4 sm:$0xff] (!%p471_p2)  }
   0xa   : > { %2117 = vmatprep.subr.bf16.mxu1 (!%p471_p2), %v2364_v4  ;;  %v2246_v21 = vld [vmem:[%s2867_s4 + $0x48] ss:$12 sps:$4 sm:$0xff] (!%p471_p2)   ;;  %v2247_v22 = vld [vmem:[%s2867_s4 + $0x50] ss:$12 sps:$4 sm:$0xff] (!%p471_p2)   ;;  %v2250_v24 = vld [vmem:[%s2867_s4 + $0x60] ss:$12 sps:$4 sm:$0xff] (!%p471_p2)  }
   0xb   : > { %v2248_v23 = vld [vmem:[%s2867_s4 + $0x64] ss:$12 sps:$4 sm:$0xff] (!%p471_p2)   ;;  %v2251_v25 = vld [vmem:[%s2867_s4 + $0x68] ss:$12 sps:$4 sm:$0xff] (!%p471_p2)   ;;  %v2255_v28 = vld [vmem:[%s2867_s4 + $0x80] ss:$12 sps:$4 sm:$0xff] (!%p471_p2)  }
   0xc   : > { %762 = vmatpush1.bf16.msra.mxu0 (!%p471_p2), %v2238_v15  ;;  %v2252_v26 = vld [vmem:[%s2867_s4 + $0x7c] ss:$12 sps:$4 sm:$0xff] (!%p471_p2)   ;;  %v2254_v27 = vld [vmem:[%s2867_s4 + $0x78] ss:$12 sps:$4 sm:$0xff] (!%p471_p2)   ;;  %v2256_v29 = vld [vmem:[%s2867_s4 + $0x94] ss:$12 sps:$4 sm:$0xff] (!%p471_p2)  }
   0xd   : > { %2118 = vmatpush3.bf16.msra.mxu1 (!%p471_p2), %v2239_v16  ;;  %763 = vmatprep.subr.bf16.mxu0 (!%p471_p2), %v2240_v17  ;;  %v2365_v30 = vmov (!%p471_p2), 0   ;;  %vm2366_vm0 = vmmov (!%p471_p2), 0   ;;  %v2258_v31 = vld [vmem:[%s2867_s4 + $0x90] ss:$12 sps:$4 sm:$0xff] (!%p471_p2)   ;;  %v2259_v32 = vld [vmem:[%s2867_s4 + $0x98] ss:$12 sps:$4 sm:$0xff] (!%p471_p2)  }
   0xe   : > { %s2883_s22 = smov (!%p523_p3, %s1965_s22), 1  ;;  %2119 = vmatprep.subr.bf16.mxu1 %v2364_v4  ;;  %791 = vmatprep.mubr.bf16.mxu0 %v2365_v30  ;;  %v2260_v33 = vld [vmem:[%s2867_s4 + $0xac] ss:$12 sps:$4 sm:$0xff]   ;;  %v2262_v34 = vld [vmem:[%s2867_s4 + $0xa8] ss:$12 sps:$4 sm:$0xff]   ;;  %v2584_v54 = vshrl.u32 %v616_v53, 7 }
   0xf   : > { %s2057_s23 = sshll.u32 %s2883_s22, 4  ;;  %2131 = vmatprep.mubr.msk.bf16.mxu1 %vm2366_vm0, %v2364_v4  ;;  %v2263_v35 = vld [vmem:[%s2867_s4 + $0xb0] ss:$12 sps:$4 sm:$0xff]   ;;  %v1974_v44 = vld [vmem:[%s2865_s2] ss:$0 sm:$0xff]  ;;  %vm854_vm1 = vcmask 261120   ;;  %s530_s24 = scalar_lea.vmem %s2864_s1, %s2883_s22 }
  0x10   : > { %s527_s27 = scalar_lea.vmem %s2881_s26, %s2057_s23  ;;  %764 = vmatpush1.bf16.msra.mxu0 %v2242_v18  ;;  %v1975_v48 = vld [vmem:[%s2866_s3] ss:$0 sm:$0xff]  ;;  %v618_v55 = vsub.s32 0, %v2584_v54  ;;  %v626_v57 = vsub.s32 2, %v2584_v54  ;;  %v622_v58 = vsub.s32 1, %v2584_v54  ;;  %vm902_vm2 = vcmask 130048   ;;  %s535_s0 = scalar_lea.vmem %s2879_s16, %s2057_s23 }
  0x11   : > { %v2471_v0 = vld [vmem:[%s527_s27] sm:$0xff]  ;;  %v2473_v1 = vld [vmem:[%s527_s27 + $0x8] sm:$0xff]  ;;  %2120 = vmatpush3.bf16.msra.mxu1 %v2243_v19  ;;  %765 = vmatprep.subr.bf16.mxu0 %v2244_v20  ;;  %s2367_s25 = smov 96   ;;  %s2368_s26 = smov 64   ;;  %vm1362_vm3 = vcmask 523264   ;;  %vm1365_vm4 = vcmask 785408  }
  0x12   : > { %542 = vadd.xlane.f32.xlu0 %v2471_v0  ;;  %2121 = vmatprep.subr.bf16.mxu1 %v2364_v4  ;;  %v614_v56 = vld [vmem:[%s2868_s5] sm:$0x7]  ;;  %s2369_s27 = smov 32  }
  0x13   : > { %v619_v59 = vrot.slane %v614_v56, %v618_v55  ;;  %v627_v60 = vrot.slane %v614_v56, %v626_v57  ;;  %v623_v63 = vrot.slane %v614_v56, %v622_v58  ;;  %v2036_v54 = vld [vmem:[%s2876_s13] ss:$0 sm:$0xff] }
  0x14   : > { %766 = vmatpush1.bf16.msra.mxu0 %v2246_v21  ;;  %v2609_v21 = vld [vmem:[%s530_s24] ss:$0 sm:$0xff] }
  0x15   : > { %2122 = vmatpush3.bf16.msra.mxu1 %v2247_v22  ;;  %767 = vmatprep.subr.bf16.mxu0 %v2248_v23 }
  0x16   : > { %544 = vadd.xlane.f32.xlu0 %v2473_v1  ;;  %2123 = vmatprep.subr.bf16.mxu1 %v2364_v4 }
  0x18   : > { %768 = vmatpush1.bf16.msra.mxu0 %v2250_v24 }
  0x19   : > { %2124 = vmatpush3.bf16.msra.mxu1 %v2251_v25  ;;  %769 = vmatprep.subr.bf16.mxu0 %v2252_v26 }
  0x1a   : > { %2125 = vmatprep.subr.bf16.mxu1 %v2364_v4 }
  0x1c   : > { %770 = vmatpush1.bf16.msra.mxu0 %v2254_v27 }
  0x1d   : > { %2126 = vmatpush3.bf16.msra.mxu1 %v2255_v28  ;;  %771 = vmatprep.subr.bf16.mxu0 %v2256_v29 }
  0x1e   : > { %2127 = vmatprep.subr.bf16.mxu1 %v2364_v4 }
  0x20   : > { %772 = vmatpush1.bf16.msra.mxu0 %v2258_v31 }
  0x21   : > { %2128 = vmatpush3.bf16.msra.mxu1 %v2259_v32  ;;  %773 = vmatprep.subr.bf16.mxu0 %v2260_v33 }
  0x22   : > { %2129 = vmatprep.subr.bf16.mxu1 %v2364_v4 }
  0x24   : > { %774 = vmatpush1.bf16.msra.mxu0 %v2262_v34 }
  0x25   : > { %2130 = vmatpush3.bf16.msra.mxu1 %v2263_v35  ;;  %2159 = vmatprep.subr.bf16.mxu0 %v2364_v4 }
  0x26   : > { %2135 = vmatprep.subr.bf16.mxu1 %v2364_v4 }
  0x9f   : > { %v543_v7 = vpop.xlane.xlu0 %542 }
  0xa0   : > { %v547_v8 = vmul.f32 0.0078125, %v543_v7 }
  0xa2   : > { %v2492_v9 = vsub.f32 %v2471_v0, %v547_v8 }
  0xa3   : > { %v545_v10 = vpop.xlane.xlu0 %544 }
  0xa4   : > { %v548_v11 = vmul.f32 0.0078125, %v545_v10  ;;  %v551_v12 = vmul.f32 %v2492_v9, %v2492_v9 }
  0xa6   : > { %v2497_v13 = vsub.f32 %v2473_v1, %v548_v11  ;;  %553 = vadd.xlane.f32.xlu1 %v551_v12 }
  0xa8   : > { %v552_v14 = vmul.f32 %v2497_v13, %v2497_v13 }
  0xaa   : > { %555 = vadd.xlane.f32.xlu1 %v552_v14 }
 0x133   : > { %v554_v36 = vpop.xlane.xlu1 %553 }
 0x134   : > { %v557_v37 = vmul.f32 0.0078125, %v554_v36 }
 0x136   : > { %v559_v38 = vadd.f32 1e-05, %v557_v37 }
 0x137   : > { %v556_v39 = vpop.xlane.xlu1 %555 }
 0x138   : > { %2312 = vrsqrt.f32 %v559_v38  ;;  %v558_v40 = vmul.f32 0.0078125, %v556_v39 }
 0x13a   : > { %v560_v41 = vadd.f32 1e-05, %v558_v40 }
 0x13c   : > { %2314 = vrsqrt.f32 %v560_v41 }
 0x142   : > { %v2313_v42 = vpop.eup %2312 }
 0x143   : > { %v563_v43 = vmul.f32 %v2313_v42, %v2492_v9 }
 0x145   : > { %v571_v47 = vmul.f32 %v1974_v44, %v563_v43 }
 0x146   : > { %v2315_v45 = vpop.eup %2314 }
 0x147   : > { %v564_v46 = vmul.f32 %v2315_v45, %v2497_v13  ;;  %v579_v50 = vadd.f32 %v1975_v48, %v571_v47 }
 0x149   : > { %v572_v49 = vmul.f32 %v1974_v44, %v564_v46 }
 0x14b   : > { %v580_v51 = vadd.f32 %v1975_v48, %v572_v49 }
 0x14d   : > { %v581_v52 = vpack.c.bf16 %v580_v51, %v579_v50 }
 0x14f   : > { %792 = vmatmul.mubr.bf16.vlgmr.msra.gmra.mrb[0].mxu0 %v581_v52  ;;  %2132 = vmatmul.mubr.bf16.vlgmr.msra.gmra.mrb[0].mxu1 %v581_v52 }
 0x150   : > { %2137 = vmatprep.mubr.msk.bf16.mxu1 %vm2366_vm0, %v2364_v4  ;;  %2161 = vmatprep.mubr.msk.bf16.mxu0 %vm2366_vm0, %v2364_v4 }
 0x222   : > { %v793_v61 = vpop.f32.mrb[0].mxu0  ;;  %v836_v62 = vpop.f32.mrb[0].mxu1 }
 0x223   : > { %v794_v2 = vadd.f32 %v793_v61, %v619_v59  ;;  %v795_v3 = vpop.f32.mrb[1].mxu0  ;;  %v2133_v5 = vpop.f32.mrb[1].mxu1  ;;  %v837_v8 = vadd.f32 %v836_v62, %v627_v60 }
 0x224   : > { %v797_v6 = vpop.f32.mrb[2].mxu0  ;;  %v839_v7 = vpop.f32.mrb[2].mxu1  ;;  %v796_v13 = vadd.f32 %v795_v3, %v623_v63 }
 0x225   : > { %v798_v9 = vadd.f32 %v797_v6, %v619_v59  ;;  %v840_v10 = vadd.f32 %v839_v7, %v627_v60  ;;  %v799_v11 = vpop.f32.mrb[3].mxu0  ;;  %v2134_v12 = vpop.f32.mrb[3].mxu1  ;;  %v843_v15 = vmul.f32 0.17677669, %v794_v2 }
 0x226   : > { %v800_v14 = vadd.f32 %v799_v11, %v623_v63 }
 0x227   : > { %v844_v16 = vmul.f32 0.17677669, %v798_v9  ;;  %v2596_v17 = vpack.c.bf16 %v840_v10, %v837_v8 }
 0x228   : > { %v846_v18 = vpack.c.bf16 %v800_v14, %v796_v13 }
 0x229   : > { %v845_v19 = vpack.c.bf16 %v844_v16, %v843_v15 }
 0x22a   : > { %v859_v20 = vsel %vm854_vm1, %v846_v18, 0 }
 0x22b   : > { %2136 = vmatpush3.bf16.xpose.msra.mxu1 %v859_v20 }
 0x22c   : > { %2141 = vmatprep.subr.bf16.mxu1 %v2364_v4 }
 0x232   : > { %2138 = vmatmul.mubr.msk.bf16.vlgmr.msra.gmra.mrb[4].mxu1 %vm854_vm1, %v845_v19 }
 0x233   : > { %2142 = vmatpush3.bf16.msra.mxu1 %v2596_v17  ;;  %2143 = vmatprep.mubr.msk.bf16.mxu1 %vm2366_vm0, %v2364_v4 }
 0x234   : > { %2147 = vmatprep.subr.bf16.mxu1 %v2364_v4 }
 0x305   : > { %v895_v22 = vpop.f32.mrb[4].mxu1 }
 0x306   : > { %v896_v23 = vadd.f32 %v2609_v21, %v895_v22  ;;  %v2139_v24 = vpop.f32.mrb[5].mxu1 }
 0x307   : > { %v898_v25 = vpop.f32.mrb[6].mxu1 }
 0x308   : > { %v899_v26 = vadd.f32 %v2609_v21, %v898_v25  ;;  %v2140_v27 = vpop.f32.mrb[7].mxu1  ;;  %v903_v28 = vsel %vm902_vm2, %v896_v23, -inf }
 0x309   : > { %904 = vmax.xlane.f32.xlu0 %v903_v28 }
 0x30a   : > { %v906_v29 = vsel %vm902_vm2, %v899_v26, -inf }
 0x30b   : > { %907 = vmax.xlane.f32.xlu1 %v906_v29 }
 0x396   : > { %v905_v31 = vpop.xlane.xlu0 %904 }
 0x397   : > { %v909_v32 = vsub.f32 %v896_v23, %v905_v31 }
 0x398   : > { %v908_v33 = vpop.xlane.xlu1 %907 }
 0x399   : > { %v911_v34 = vmul.f32 1.442695, %v909_v32  ;;  %v910_v35 = vsub.f32 %v899_v26, %v908_v33 }
 0x39b   : > { %2316 = vpow2.f32 %v911_v34  ;;  %v913_v36 = vmul.f32 1.442695, %v910_v35 }
 0x39d   : > { %2318 = vpow2.f32 %v913_v36 }
 0x3a5   : > { %v2317_v37 = vpop.eup %2316 }
 0x3a6   : > { %v915_v38 = vsel %vm902_vm2, %v2317_v37, 0.0 }
 0x3a7   : > { %v2319_v39 = vpop.eup %2318  ;;  %916 = vadd.xlane.f32.xlu0 %v915_v38 }
 0x3a8   : > { %v918_v40 = vsel %vm902_vm2, %v2319_v39, 0.0 }
 0x3a9   : > { %919 = vadd.xlane.f32.xlu1 %v918_v40 }
 0x3ba   : > { %971 = vrot.lane.b32.xlu1 %v845_v19, %s2367_s25 }
 0x3bd   : > { %974 = vrot.lane.b32.xlu0 %v846_v18, %s2367_s25 }
 0x3be   : > { %1096 = vrot.lane.b32.xlu1 %v846_v18, %s2368_s26 }
 0x3c1   : > { %1217 = vrot.lane.b32.xlu0 %v846_v18, %s2369_s27 }
 0x3c2   : > { %1094 = vrot.lane.b32.xlu1 %v845_v19, %s2368_s26 }
 0x3c6   : > { %1215 = vrot.lane.b32.xlu1 %v845_v19, %s2369_s27 }
 0x434   : > { %v917_v41 = vpop.xlane.xlu0 %916 }
 0x435   : > { %2320 = vrcp.f32 %v917_v41 }
 0x436   : > { %v920_v42 = vpop.xlane.xlu1 %919 }
 0x437   : > { %2322 = vrcp.f32 %v920_v42 }
 0x438   : > { %v975_v44 = vpop.permute.xlu0 %974 }
 0x439   : > { %v980_v53 = vsel %vm854_vm1, %v975_v44, 0 }
 0x43a   : > { %v972_v43 = vpop.permute.xlu1 %971 }
 0x43c   : > { %v1218_v51 = vpop.permute.xlu0 %1217 }
 0x43d   : > { %v1223_v57 = vsel %vm854_vm1, %v1218_v51, 0 }
 0x43e   : > { %v1097_v45 = vpop.permute.xlu1 %1096 }
 0x43f   : > { %v2321_v46 = vpop.eup %2320  ;;  %v1102_v47 = vsel %vm854_vm1, %v1097_v45, 0 }
 0x440   : > { %2160 = vmatpush3.bf16.xpose.msra.mxu0 %v1102_v47  ;;  %v923_v49 = vmul.f32 %v2321_v46, %v2317_v37 }
 0x441   : > { %v2323_v48 = vpop.eup %2322  ;;  %2171 = vmatprep.subr.bf16.mxu0 %v2364_v4 }
 0x442   : > { %v924_v50 = vmul.f32 %v2323_v48, %v2319_v39  ;;  %v1095_v56 = vpop.permute.xlu1 %1094 }
 0x444   : > { %v925_v52 = vpack.c.bf16 %v924_v50, %v923_v49 }
 0x446   : > { %2144 = vmatmul.mubr.msk.bf16.vlgmr.msra.gmra.mrb[8].mxu1 %vm902_vm2, %v925_v52  ;;  %v1216_v59 = vpop.permute.xlu1 %1215 }
 0x447   : > { %2148 = vmatpush3.bf16.xpose.msra.mxu1 %v980_v53  ;;  %2162 = vmatmul.mubr.msk.bf16.vlgmr.msra.gmra.mrb[4].mxu0 %vm854_vm1, %v1095_v56 }
 0x448   : > { %2172 = vmatpush3.bf16.xpose.msra.mxu0 %v1223_v57  ;;  %2149 = vmatprep.mubr.msk.bf16.mxu1 %vm2366_vm0, %v2364_v4 }
 0x449   : > { %2173 = vmatprep.mubr.msk.bf16.mxu0 %vm2366_vm0, %v2364_v4  ;;  %2153 = vmatprep.subr.bf16.mxu1 %v2364_v4 }
 0x44a   : > { %2183 = vmatprep.subr.bf16.mxu0 %v2364_v4 }
 0x44e   : > { %2150 = vmatmul.mubr.msk.bf16.vlgmr.msra.gmra.mrb[12].mxu1 %vm854_vm1, %v972_v43 }
 0x44f   : > { %2174 = vmatmul.mubr.msk.bf16.vlgmr.msra.gmra.mrb[8].mxu0 %vm854_vm1, %v1216_v59  ;;  %2155 = vmatprep.mubr.msk.bf16.mxu1 %vm2366_vm0, %v2364_v4 }
 0x450   : > { %2199 = vmatprep.mubr.msk.bf16.mxu0 %vm2366_vm0, %v2364_v4 }
 0x519   : > { %v2641_v60 = vpop.f32.mrb[8].mxu1 }
 0x51a   : > { %v2145_v61 = vpop.f32.mrb[9].mxu1  ;;  %v1138_v62 = vpop.f32.mrb[4].mxu0 }
 0x51b   : > { %v2643_v63 = vpop.f32.mrb[10].mxu1  ;;  %v2163_v2 = vpop.f32.mrb[5].mxu0  ;;  %v1139_v13 = vadd.f32 %v2609_v21, %v1138_v62 }
 0x51c   : > { %v2146_v3 = vpop.f32.mrb[11].mxu1  ;;  %v1141_v5 = vpop.f32.mrb[6].mxu0 }
 0x51d   : > { %v2164_v6 = vpop.f32.mrb[7].mxu0  ;;  %v1142_v23 = vadd.f32 %v2609_v21, %v1141_v5  ;;  %v1145_v24 = vsel %vm902_vm2, %v1139_v13, -inf }
 0x51f   : > { %v1148_v27 = vsel %vm902_vm2, %v1142_v23, -inf }
 0x521   : > { %v1016_v7 = vpop.f32.mrb[12].mxu1 }
 0x522   : > { %v1017_v8 = vadd.f32 %v2609_v21, %v1016_v7  ;;  %v2151_v9 = vpop.f32.mrb[13].mxu1  ;;  %v1259_v10 = vpop.f32.mrb[8].mxu0 }
 0x523   : > { %v1019_v11 = vpop.f32.mrb[14].mxu1  ;;  %v2175_v12 = vpop.f32.mrb[9].mxu0  ;;  %v1260_v26 = vadd.f32 %v2609_v21, %v1259_v10 }
 0x524   : > { %v1020_v14 = vadd.f32 %v2609_v21, %v1019_v11  ;;  %v2152_v15 = vpop.f32.mrb[15].mxu1  ;;  %v1262_v16 = vpop.f32.mrb[10].mxu0  ;;  %v1023_v18 = vsel %vm902_vm2, %v1017_v8, -inf }
 0x525   : > { %v2176_v19 = vpop.f32.mrb[11].mxu0  ;;  %1024 = vmax.xlane.f32.xlu0 %v1023_v18  ;;  %v1263_v20 = vadd.f32 %v2609_v21, %v1262_v16  ;;  %v1266_v28 = vsel %vm902_vm2, %v1260_v26, -inf }
 0x526   : > { %v1026_v22 = vsel %vm902_vm2, %v1020_v14, -inf }
 0x527   : > { %1027 = vmax.xlane.f32.xlu1 %v1026_v22  ;;  %v1269_v25 = vsel %vm902_vm2, %v1263_v20, -inf }
 0x529   : > { %1146 = vmax.xlane.f32.xlu0 %v1145_v24 }
 0x52b   : > { %1270 = vmax.xlane.f32.xlu1 %v1269_v25 }
 0x52d   : > { %1149 = vmax.xlane.f32.xlu0 %v1148_v27 }
 0x531   : > { %1267 = vmax.xlane.f32.xlu0 %v1266_v28  ;;  %v2264_v28 = vld [vmem:[%s2869_s6] sm:$0xff]  }
 0x532   : > { %2184 = vmatpush3.bf16.msra.mxu0 %v2264_v28  ;;  %v2278_v28 = vld [vmem:[%s2873_s10 + $0x20] ss:$8 sps:$4 sm:$0xff]  }
 0x533   : > { %2185 = vmatprep.subr.bf16.mxu0 %v2364_v4 }
 0x5b2   : > { %v1025_v29 = vpop.xlane.xlu0 %1024 }
 0x5b3   : > { %v1029_v39 = vsub.f32 %v1017_v8, %v1025_v29  ;;  %v2265_v29 = vld [vmem:[%s2869_s6 + $0x8] sm:$0xff]  }
 0x5b4   : > { %v1028_v31 = vpop.xlane.xlu1 %1027  ;;  %2186 = vmatpush3.bf16.msra.mxu0 %v2265_v29  ;;  %v2283_v29 = vld [vmem:[%s2873_s10 + $0x34] ss:$8 sps:$4 sm:$0xff]  }
 0x5b5   : > { %v1030_v40 = vsub.f32 %v1020_v14, %v1028_v31  ;;  %v1031_v44 = vmul.f32 1.442695, %v1029_v39  ;;  %v2266_v31 = vld [vmem:[%s2869_s6 + $0x10] sm:$0xff]   ;;  %2187 = vmatprep.subr.bf16.mxu0 %v2364_v4 }
 0x5b6   : > { %v1147_v32 = vpop.xlane.xlu0 %1146  ;;  %v2270_v39 = vld [vmem:[%s2869_s6 + $0x30] sm:$0xff]  }
 0x5b7   : > { %v1151_v33 = vsub.f32 %v1139_v13, %v1147_v32  ;;  %v1033_v45 = vmul.f32 1.442695, %v1030_v40  ;;  %v2268_v32 = vld [vmem:[%s2869_s6 + $0x20] sm:$0xff]  }
 0x5b8   : > { %v1271_v34 = vpop.xlane.xlu1 %1270  ;;  %2188 = vmatpush3.bf16.msra.mxu0 %v2266_v31  ;;  %v2281_v31 = vld [vmem:[%s2873_s10 + $0x30] ss:$8 sps:$4 sm:$0xff]  }
 0x5b9   : > { %v1153_v35 = vmul.f32 1.442695, %v1151_v33  ;;  %v1273_v36 = vsub.f32 %v1263_v20, %v1271_v34  ;;  %2189 = vmatprep.subr.bf16.mxu0 %v2364_v4 }
 0x5ba   : > { %v1150_v37 = vpop.xlane.xlu0 %1149 }
 0x5bb   : > { %2324 = vpow2.f32 %v1153_v35  ;;  %v1152_v38 = vsub.f32 %v1142_v23, %v1150_v37  ;;  %v1276_v41 = vmul.f32 1.442695, %v1273_v36  ;;  %v2269_v35 = vld [vmem:[%s2869_s6 + $0x28] sm:$0xff]  }
 0x5bd   : > { %v1155_v21 = vmul.f32 1.442695, %v1152_v38 }
 0x5be   : > { %v1268_v42 = vpop.xlane.xlu0 %1267 }
 0x5bf   : > { %2326 = vpow2.f32 %v1155_v21  ;;  %v1272_v43 = vsub.f32 %v1260_v26, %v1268_v42  ;;  %v2271_v21 = vld [vmem:[%s2869_s6 + $0x38] sm:$0xff]  }
 0x5c0   : > { %2328 = vpow2.f32 %v1276_v41 }
 0x5c1   : > { %v1274_v46 = vmul.f32 1.442695, %v1272_v43 }
 0x5c3   : > { %2330 = vpow2.f32 %v1274_v46 }
 0x5c4   : > { %2332 = vpow2.f32 %v1031_v44 }
 0x5c5   : > { %v2325_v47 = vpop.eup %2324  ;;  %2334 = vpow2.f32 %v1033_v45 }
 0x5c6   : > { %v1157_v48 = vsel %vm902_vm2, %v2325_v47, 0.0 }
 0x5c7   : > { %1158 = vadd.xlane.f32.xlu0 %v1157_v48 }
 0x5c9   : > { %v2327_v49 = vpop.eup %2326 }
 0x5ca   : > { %v1160_v50 = vsel %vm902_vm2, %v2327_v49, 0.0  ;;  %v2329_v51 = vpop.eup %2328 }
 0x5cb   : > { %1161 = vadd.xlane.f32.xlu1 %v1160_v50  ;;  %v1281_v57 = vsel %vm902_vm2, %v2329_v51, 0.0 }
 0x5cd   : > { %v2331_v52 = vpop.eup %2330 }
 0x5ce   : > { %v2333_v53 = vpop.eup %2332  ;;  %v1278_v56 = vsel %vm902_vm2, %v2331_v52, 0.0 }
 0x5cf   : > { %v2335_v59 = vpop.eup %2334  ;;  %1279 = vadd.xlane.f32.xlu0 %v1278_v56  ;;  %1282 = vadd.xlane.f32.xlu1 %v1281_v57  ;;  %v1035_v61 = vsel %vm902_vm2, %v2333_v53, 0.0 }
 0x5d0   : > { %v1038_v62 = vsel %vm902_vm2, %v2335_v59, 0.0 }
 0x5d3   : > { %1036 = vadd.xlane.f32.xlu0 %v1035_v61  ;;  %1039 = vadd.xlane.f32.xlu1 %v1038_v62 }
 0x5e4   : > { %1168 = vrot.lane.b32.xlu1 %v2596_v17, %s2368_s26 }
 0x5e8   : > { %1289 = vrot.lane.b32.xlu1 %v2596_v17, %s2369_s27 }
 0x5e9   : > { %1047 = vrot.lane.b32.xlu0 %v2596_v17, %s2367_s25 }
 0x654   : > { %v1159_v2 = vpop.xlane.xlu0 %1158 }
 0x658   : > { %v1162_v3 = vpop.xlane.xlu1 %1161 }
 0x65c   : > { %v1280_v5 = vpop.xlane.xlu0 %1279  ;;  %v1283_v6 = vpop.xlane.xlu1 %1282 }
 0x660   : > { %v1037_v7 = vpop.xlane.xlu0 %1036  ;;  %v1040_v8 = vpop.xlane.xlu1 %1039 }
 0x661   : > { %2336 = vrcp.f32 %v1037_v7 }
 0x662   : > { %2338 = vrcp.f32 %v1040_v8 }
 0x663   : > { %2340 = vrcp.f32 %v1162_v3 }
 0x664   : > { %v1048_v9 = vpop.permute.xlu0 %1047  ;;  %2342 = vrcp.f32 %v1159_v2  ;;  %v1169_v15 = vpop.permute.xlu1 %1168 }
 0x665   : > { %2154 = vmatpush3.bf16.msra.mxu1 %v1048_v9  ;;  %2344 = vrcp.f32 %v1280_v5  ;;  %v2009_v9 = vld [vmem:[%s2870_s7] ss:$0 sm:$0xff] }
 0x666   : > { %2165 = vmatprep.subr.bf16.mxu1 %v2364_v4  ;;  %2346 = vrcp.f32 %v1283_v6 }
 0x668   : > { %v1290_v24 = vpop.permute.xlu1 %1289 }
 0x66b   : > { %v2337_v10 = vpop.eup %2336 }
 0x66c   : > { %v2339_v11 = vpop.eup %2338  ;;  %v1043_v12 = vmul.f32 %v2337_v10, %v2333_v53 }
 0x66d   : > { %v1044_v13 = vmul.f32 %v2339_v11, %v2335_v59  ;;  %v2341_v14 = vpop.eup %2340 }
 0x66e   : > { %v2343_v16 = vpop.eup %2342  ;;  %v1166_v18 = vmul.f32 %v2341_v14, %v2327_v49 }
 0x66f   : > { %v1045_v17 = vpack.c.bf16 %v1044_v13, %v1043_v12  ;;  %v1165_v19 = vmul.f32 %v2343_v16, %v2325_v47  ;;  %v2345_v20 = vpop.eup %2344  ;;  %v2274_v16 = vld [vmem:[%s2873_s10 + $0x4] ss:$8 sps:$4 sm:$0xff]  }
 0x670   : > { %v2347_v23 = vpop.eup %2346  ;;  %v1286_v25 = vmul.f32 %v2345_v20, %v2331_v52 }
 0x671   : > { %2156 = vmatmul.mubr.msk.bf16.vlgmr.msra.gmra.mrb[16].mxu1 %vm902_vm2, %v1045_v17  ;;  %v1167_v22 = vpack.c.bf16 %v1166_v18, %v1165_v19  ;;  %v1287_v26 = vmul.f32 %v2347_v23, %v2329_v51 }
 0x672   : > { %2166 = vmatpush3.bf16.msra.mxu1 %v1169_v15  ;;  %2167 = vmatprep.mubr.msk.bf16.mxu1 %vm2366_vm0, %v2364_v4  ;;  %v2272_v15 = vld [vmem:[%s2873_s10] ss:$8 sps:$4 sm:$0xff]  }
 0x673   : > { %2177 = vmatprep.subr.bf16.mxu1 %v2364_v4  ;;  %v1288_v27 = vpack.c.bf16 %v1287_v26, %v1286_v25 }
 0x679   : > { %2168 = vmatmul.mubr.msk.bf16.vlgmr.msra.gmra.mrb[20].mxu1 %vm902_vm2, %v1167_v22 }
 0x67a   : > { %2178 = vmatpush3.bf16.msra.mxu1 %v1290_v24  ;;  %2179 = vmatprep.mubr.msk.bf16.mxu1 %vm2366_vm0, %v2364_v4 }
 0x67b   : > { %1632 = vmatprep.subr.bf16.mxu1 %v2274_v16 }
 0x681   : > { %2180 = vmatmul.mubr.msk.bf16.vlgmr.msra.gmra.mrb[24].mxu1 %vm902_vm2, %v1288_v27  ;;  %v2280_v27 = vld [vmem:[%s2873_s10 + $0x24] ss:$8 sps:$4 sm:$0xff]  }
 0x682   : > { %1664 = vmatprep.mubr.bf16.mxu1 %v2365_v30  ;;  %v2267_v30 = vld [vmem:[%s2869_s6 + $0x18] sm:$0xff]   ;;  %1633 = vmatpush1.bf16.msra.mxu1 %v2272_v15 }
 0x683   : > { %2190 = vmatpush3.bf16.msra.mxu0 %v2267_v30  ;;  %v2286_v30 = vld [vmem:[%s2873_s10 + $0x44] ss:$8 sps:$4 sm:$0xff]  }
 0x684   : > { %2191 = vmatprep.subr.bf16.mxu0 %v2364_v4 }
 0x687   : > { %2192 = vmatpush3.bf16.msra.mxu0 %v2268_v32  ;;  %v2284_v32 = vld [vmem:[%s2873_s10 + $0x40] ss:$8 sps:$4 sm:$0xff]  }
 0x688   : > { %2193 = vmatprep.subr.bf16.mxu0 %v2364_v4 }
 0x68b   : > { %2194 = vmatpush3.bf16.msra.mxu0 %v2269_v35  ;;  %v2292_v35 = vld [vmem:[%s2873_s10 + $0x64] ss:$8 sps:$4 sm:$0xff]  }
 0x68c   : > { %2195 = vmatprep.subr.bf16.mxu0 %v2364_v4 }
 0x68f   : > { %2196 = vmatpush3.bf16.msra.mxu0 %v2270_v39  ;;  %v2296_v39 = vld [vmem:[%s2875_s12 + $0x40] sm:$0xff]  }
 0x690   : > { %2197 = vmatprep.subr.bf16.mxu0 %v2364_v4 }
 0x693   : > { %2198 = vmatpush3.bf16.msra.mxu0 %v2271_v21  ;;  %v2299_v21 = vld [vmem:[%s2875_s12 + $0x8] sm:$0xff]  }
 0x694   : > { %2093 = vmatprep.subr.bf16.mxu0 %v2296_v39 }
 0x744   : > { %v1087_v33 = vpop.f32.mrb[16].mxu1 }
 0x745   : > { %v2157_v34 = vpop.f32.mrb[17].mxu1 }
 0x746   : > { %v1090_v36 = vpop.f32.mrb[18].mxu1  ;;  %v2287_v34 = vld [vmem:[%s2873_s10 + $0x50] ss:$8 sps:$4 sm:$0xff]  }
 0x747   : > { %v2217_v37 = vpack.i.bf16 %v1090_v36, %v1087_v33  ;;  %v2158_v38 = vpop.f32.mrb[19].mxu1  ;;  %v2289_v33 = vld [vmem:[%s2873_s10 + $0x54] ss:$8 sps:$4 sm:$0xff]   ;;  %v2290_v36 = vld [vmem:[%s2873_s10 + $0x60] ss:$8 sps:$4 sm:$0xff]  }
 0x748   : > { %v2293_v38 = vld [vmem:[%s2873_s10 + $0x70] ss:$8 sps:$4 sm:$0xff]  }
 0x749   : > { %2218 = vrot.lane.b32.xlu1 %v2217_v37, %s2369_s27  ;;  %v2295_v37 = vld [vmem:[%s2873_s10 + $0x74] ss:$8 sps:$4 sm:$0xff]  }
 0x74c   : > { %v1208_v40 = vpop.f32.mrb[20].mxu1 }
 0x74d   : > { %v2169_v41 = vpop.f32.mrb[21].mxu1 }
 0x74e   : > { %v1211_v42 = vpop.f32.mrb[22].mxu1  ;;  %v2298_v41 = vld [vmem:[%s2875_s12 + $0x48] sm:$0xff]  }
 0x74f   : > { %v2222_v43 = vpack.i.bf16 %v1211_v42, %v1208_v40  ;;  %v2170_v44 = vpop.f32.mrb[23].mxu1  ;;  %v2297_v40 = vld [vmem:[%s2875_s12] sm:$0xff]   ;;  %v2300_v42 = vld [vmem:[%s2875_s12 + $0x50] sm:$0xff]  }
 0x750   : > { %v2302_v44 = vld [vmem:[%s2875_s12 + $0x58] sm:$0xff]  }
 0x751   : > { %2223 = vrot.lane.b32.xlu0 %v2222_v43, %s2368_s26  ;;  %v2301_v43 = vld [vmem:[%s2875_s12 + $0x10] sm:$0xff]  }
 0x754   : > { %v1329_v45 = vpop.f32.mrb[24].mxu1 }
 0x755   : > { %v2181_v46 = vpop.f32.mrb[25].mxu1 }
 0x756   : > { %v1332_v47 = vpop.f32.mrb[26].mxu1  ;;  %v2304_v46 = vld [vmem:[%s2875_s12 + $0x60] sm:$0xff]  }
 0x757   : > { %v2227_v48 = vpack.i.bf16 %v1332_v47, %v1329_v45  ;;  %v2182_v49 = vpop.f32.mrb[27].mxu1  ;;  %v2303_v45 = vld [vmem:[%s2875_s12 + $0x18] sm:$0xff]   ;;  %v2305_v47 = vld [vmem:[%s2875_s12 + $0x20] sm:$0xff]  }
 0x759   : > { %2228 = vrot.lane.b32.xlu1 %v2227_v48, %s2367_s25  ;;  %v2306_v48 = vld [vmem:[%s2875_s12 + $0x68] sm:$0xff]  }
 0x7bb   : > { %v2219_v50 = vpop.permute.xlu1 %2218 }
 0x7bc   : > { %v2221_v51 = vunpack.i.h.bf16 %v2219_v50  ;;  %v2220_v52 = vunpack.i.l.bf16 %v2219_v50 }
 0x7be   : > { %v1361_v59 = vsel %vm854_vm1, %v2643_v63, %v2221_v51  ;;  %v1360_v61 = vsel %vm854_vm1, %v2641_v60, %v2220_v52 }
 0x7c3   : > { %v2224_v4 = vpop.permute.xlu0 %2223 }
 0x7c4   : > { %v2226_v53 = vunpack.i.h.bf16 %v2224_v4  ;;  %v2225_v56 = vunpack.i.l.bf16 %v2224_v4 }
 0x7c6   : > { %v1364_v3 = vsel %vm1362_vm3, %v1361_v59, %v2226_v53  ;;  %v1363_v5 = vsel %vm1362_vm3, %v1360_v61, %v2225_v56  ;;  %v2018_v59 = vld [vmem:[%s2871_s8] ss:$0 sm:$0xff] }
 0x7cb   : > { %v2229_v57 = vpop.permute.xlu1 %2228 }
 0x7cc   : > { %v2231_v62 = vunpack.i.h.bf16 %v2229_v57  ;;  %v2230_v2 = vunpack.i.l.bf16 %v2229_v57 }
 0x7ce   : > { %v1367_v6 = vsel %vm1365_vm4, %v1364_v3, %v2231_v62  ;;  %v1366_v7 = vsel %vm1365_vm4, %v1363_v5, %v2230_v2  ;;  %v2019_v3 = vld [vmem:[%s2872_s9] ss:$0 sm:$0xff] }
 0x7cf   : > { %v1368_v8 = vpack.c.bf16 %v1367_v6, %v1366_v7 }
 0x7d1   : > { %2200 = vmatmul.mubr.bf16.vlgmr.msra.gmra.mrb[12].mxu0 %v1368_v8 }
 0x7d2   : > { %2094 = vmatpush3.bf16.msra.mxu0 %v2297_v40 }
 0x7d3   : > { %2095 = vmatprep.subr.bf16.mxu0 %v2298_v41 }
 0x7d6   : > { %2096 = vmatpush3.bf16.msra.mxu0 %v2299_v21 }
 0x7d7   : > { %2097 = vmatprep.subr.bf16.mxu0 %v2300_v42 }
 0x7da   : > { %2098 = vmatpush3.bf16.msra.mxu0 %v2301_v43 }
 0x7db   : > { %2099 = vmatprep.subr.bf16.mxu0 %v2302_v44 }
 0x7de   : > { %2100 = vmatpush3.bf16.msra.mxu0 %v2303_v45 }
 0x7df   : > { %2101 = vmatprep.subr.bf16.mxu0 %v2304_v46 }
 0x7e2   : > { %2102 = vmatpush3.bf16.msra.mxu0 %v2305_v47 }
 0x7e3   : > { %2103 = vmatprep.subr.bf16.mxu0 %v2306_v48 }
 0x8a4   : > { %v1474_v10 = vpop.f32.mrb[12].mxu0 }
 0x8a5   : > { %v1475_v11 = vadd.f32 %v2009_v9, %v1474_v10  ;;  %v2201_v12 = vpop.f32.mrb[13].mxu0  ;;  %v2308_v10 = vld [vmem:[%s2875_s12 + $0x70] sm:$0xff]  }
 0x8a6   : > { %v1477_v13 = vpop.f32.mrb[14].mxu0  ;;  %v2310_v12 = vld [vmem:[%s2875_s12 + $0x78] sm:$0xff]  }
 0x8a7   : > { %v2721_v63 = vadd.f32 %v1475_v11, %v2471_v0  ;;  %v1478_v60 = vadd.f32 %v2009_v9, %v1477_v13  ;;  %v2202_v17 = vpop.f32.mrb[15].mxu0  ;;  %v2277_v0 = vld [vmem:[%s2873_s10 + $0x14] ss:$8 sps:$4 sm:$0xff]   ;;  %v2307_v9 = vld [vmem:[%s2875_s12 + $0x28] sm:$0xff]  }
 0x8a8   : > { %1634 = vmatprep.subr.bf16.mxu1 %v2277_v0  ;;  %2104 = vmatpush3.bf16.msra.mxu0 %v2307_v9  ;;  %v2309_v11 = vld [vmem:[%s2875_s12 + $0x30] sm:$0xff]   ;;  %v2311_v13 = vld [vmem:[%s2875_s12 + $0x38] sm:$0xff]  }
 0x8a9   : > { %v2724_v14 = vadd.f32 %v1478_v60, %v2473_v1  ;;  %1485 = vadd.xlane.f32.xlu0 %v2721_v63  ;;  %v2275_v1 = vld [vmem:[%s2873_s10 + $0x10] ss:$8 sps:$4 sm:$0xff]   ;;  %2105 = vmatprep.subr.bf16.mxu0 %v2308_v10  ;;  %v1540_v60 = vld [vmem:[%s2874_s11] sm:$0x3] }
 0x8aa   : > { %1635 = vmatpush1.bf16.msra.mxu1 %v2275_v1  ;;  %v1545_v17 = vrot.slane %v1540_v60, %v618_v55  ;;  %v1549_v15 = vrot.slane %v1540_v60, %v622_v58 }
 0x8ab   : > { %1487 = vadd.xlane.f32.xlu1 %v2724_v14  ;;  %1636 = vmatprep.subr.bf16.mxu1 %v2280_v27 }
 0x8ac   : > { %2106 = vmatpush3.bf16.msra.mxu0 %v2309_v11 }
 0x8ad   : > { %2107 = vmatprep.subr.bf16.mxu0 %v2310_v12 }
 0x8ae   : > { %1637 = vmatpush1.bf16.msra.mxu1 %v2278_v28 }
 0x8af   : > { %1638 = vmatprep.subr.bf16.mxu1 %v2283_v29 }
 0x8b0   : > { %2108 = vmatpush3.bf16.msra.mxu0 %v2311_v13 }
 0x8b2   : > { %1639 = vmatpush1.bf16.msra.mxu1 %v2281_v31 }
 0x8b3   : > { %1640 = vmatprep.subr.bf16.mxu1 %v2286_v30 }
 0x8b6   : > { %1641 = vmatpush1.bf16.msra.mxu1 %v2284_v32 }
 0x8b7   : > { %1642 = vmatprep.subr.bf16.mxu1 %v2289_v33 }
 0x8ba   : > { %1643 = vmatpush1.bf16.msra.mxu1 %v2287_v34 }
 0x8bb   : > { %1644 = vmatprep.subr.bf16.mxu1 %v2292_v35 }
 0x8be   : > { %1645 = vmatpush1.bf16.msra.mxu1 %v2290_v36 }
 0x8bf   : > { %1646 = vmatprep.subr.bf16.mxu1 %v2295_v37 }
 0x8c2   : > { %1647 = vmatpush1.bf16.msra.mxu1 %v2293_v38 }
 0x936   : > { %v1486_v18 = vpop.xlane.xlu0 %1485 }
 0x937   : > { %v1489_v19 = vmul.f32 0.0078125, %v1486_v18 }
 0x938   : > { %v1488_v20 = vpop.xlane.xlu1 %1487 }
 0x939   : > { %v1491_v22 = vsub.f32 %v2721_v63, %v1489_v19  ;;  %v1490_v23 = vmul.f32 0.0078125, %v1488_v20 }
 0x93b   : > { %v2742_v24 = vsub.f32 %v2724_v14, %v1490_v23  ;;  %v1493_v25 = vmul.f32 %v1491_v22, %v1491_v22 }
 0x93d   : > { %1495 = vadd.xlane.f32.xlu0 %v1493_v25  ;;  %v1494_v26 = vmul.f32 %v2742_v24, %v2742_v24 }
 0x941   : > { %1497 = vadd.xlane.f32.xlu0 %v1494_v26 }
 0x9ca   : > { %v1496_v49 = vpop.xlane.xlu0 %1495 }
 0x9cb   : > { %v1499_v50 = vmul.f32 0.0078125, %v1496_v49 }
 0x9cd   : > { %v1501_v4 = vadd.f32 1e-05, %v1499_v50  ;;  %v2053_v50 = vld [vmem:[%s2877_s14] ss:$0 sm:$0xff] }
 0x9ce   : > { %v1498_v51 = vpop.xlane.xlu0 %1497 }
 0x9cf   : > { %2348 = vrsqrt.f32 %v1501_v4  ;;  %v1500_v52 = vmul.f32 0.0078125, %v1498_v51 }
 0x9d1   : > { %v1502_v53 = vadd.f32 1e-05, %v1500_v52  ;;  %v2054_v52 = vld [vmem:[%s2878_s15] ss:$0 sm:$0xff] }
 0x9d3   : > { %2350 = vrsqrt.f32 %v1502_v53 }
 0x9d9   : > { %v2349_v56 = vpop.eup %2348 }
 0x9da   : > { %v1505_v57 = vmul.f32 %v2349_v56, %v1491_v22 }
 0x9dc   : > { %v1513_v2 = vmul.f32 %v2018_v59, %v1505_v57 }
 0x9dd   : > { %v2351_v61 = vpop.eup %2350 }
 0x9de   : > { %v1506_v62 = vmul.f32 %v2351_v61, %v2742_v24  ;;  %v1521_v6 = vadd.f32 %v2019_v3, %v1513_v2 }
 0x9e0   : > { %v1514_v5 = vmul.f32 %v2018_v59, %v1506_v62 }
 0x9e2   : > { %v1522_v7 = vadd.f32 %v2019_v3, %v1514_v5 }
 0x9e4   : > { %v1523_v8 = vpack.c.bf16 %v1522_v7, %v1521_v6 }
 0x9e6   : > { %1665 = vmatmul.mubr.bf16.vlgmr.msra.gmra.mrb[28].mxu1 %v1523_v8 }
 0xab9   : > { %v1666_v16 = vpop.f32.mrb[28].mxu1 }
 0xaba   : > { %v1667_v0 = vadd.f32 %v1666_v16, %v1545_v17  ;;  %v1668_v1 = vpop.f32.mrb[29].mxu1 }
 0xabb   : > { %v1669_v18 = vadd.f32 %v1668_v1, %v1549_v15  ;;  %v1670_v19 = vpop.f32.mrb[30].mxu1 }
 0xabc   : > { %v1671_v20 = vadd.f32 %v1670_v19, %v1545_v17  ;;  %v1672_v22 = vpop.f32.mrb[31].mxu1  ;;  %v1675_v24 = vmax.f32 %v1667_v0, 0.0 }
 0xabd   : > { %v1673_v23 = vadd.f32 %v1672_v22, %v1549_v15  ;;  %v1676_v26 = vmax.f32 %v1669_v18, 0.0 }
 0xabe   : > { %v1677_v25 = vmax.f32 %v1671_v20, 0.0 }
 0xabf   : > { %v1678_v27 = vmax.f32 %v1673_v23, 0.0 }
 0xac0   : > { %v1679_v28 = vpack.c.bf16 %v1677_v25, %v1675_v24 }
 0xac1   : > { %v1680_v29 = vpack.c.bf16 %v1678_v27, %v1676_v26 }
 0xac3   : > { %1848 = vmatprep.mubr.bf16.mxu0 %v1680_v29 }
 0xac4   : > { %1849 = vmatmul.mubr.bf16.vlgmr.msra.gmra.mrb[16].mxu0 %v1679_v28 }
 0xb97   : > { %v2109_v55 = vpop.f32.mrb[16].mxu0 }
 0xb98   : > { %v2110_v58 = vpop.f32.mrb[17].mxu0 }
 0xb99   : > { %v2111_v31 = vadd.f32 %v2110_v58, %v2109_v55  ;;  %v2112_v30 = vpop.f32.mrb[18].mxu0 }
 0xb9a   : > { %v2113_v32 = vpop.f32.mrb[19].mxu0 }
 0xb9b   : > { %v1851_v33 = vadd.f32 %v2111_v31, %v2036_v54  ;;  %v2114_v34 = vadd.f32 %v2113_v32, %v2112_v30 }
 0xb9d   : > { %v1854_v35 = vadd.f32 %v2114_v34, %v2036_v54  ;;  %v1857_v36 = vadd.f32 %v1851_v33, %v2721_v63 }
 0xb9f   : > { %1861 = vadd.xlane.f32.xlu0 %v1857_v36  ;;  %v1858_v37 = vadd.f32 %v1854_v35, %v2724_v14 }
 0xba1   : > { %1863 = vadd.xlane.f32.xlu1 %v1858_v37 }
 0xc2c   : > { %v1862_v38 = vpop.xlane.xlu0 %1861 }
 0xc2d   : > { %v1865_v39 = vmul.f32 0.0078125, %v1862_v38 }
 0xc2e   : > { %v1864_v40 = vpop.xlane.xlu1 %1863 }
 0xc2f   : > { %v1867_v41 = vsub.f32 %v1857_v36, %v1865_v39  ;;  %v1866_v21 = vmul.f32 0.0078125, %v1864_v40 }
 0xc31   : > { %v1868_v42 = vsub.f32 %v1858_v37, %v1866_v21  ;;  %v1869_v43 = vmul.f32 %v1867_v41, %v1867_v41 }
 0xc33   : > { %1871 = vadd.xlane.f32.xlu0 %v1869_v43  ;;  %v1870_v44 = vmul.f32 %v1868_v42, %v1868_v42 }
 0xc35   : > { %1873 = vadd.xlane.f32.xlu1 %v1870_v44 }
 0xcc0   : > { %v1872_v45 = vpop.xlane.xlu0 %1871 }
 0xcc1   : > { %v1875_v46 = vmul.f32 0.0078125, %v1872_v45 }
 0xcc2   : > { %v1874_v47 = vpop.xlane.xlu1 %1873 }
 0xcc3   : > { %v1877_v48 = vadd.f32 1e-05, %v1875_v46  ;;  %v1876_v63 = vmul.f32 0.0078125, %v1874_v47 }
 0xcc5   : > { %2352 = vrsqrt.f32 %v1877_v48  ;;  %v1878_v49 = vadd.f32 1e-05, %v1876_v63 }
 0xcc7   : > { %2354 = vrsqrt.f32 %v1878_v49 }
 0xccf   : > { %v2353_v14 = vpop.eup %2352 }
 0xcd0   : > { %v1881_v4 = vmul.f32 %v2353_v14, %v1867_v41 }
 0xcd1   : > { %v2355_v51 = vpop.eup %2354 }
 0xcd2   : > { %v1889_v53 = vmul.f32 %v2053_v50, %v1881_v4  ;;  %v1882_v56 = vmul.f32 %v2355_v51, %v1868_v42 }
 0xcd4   : > { %v1897_v57 = vadd.f32 %v2054_v52, %v1889_v53  ;;  %v1890_v59 = vmul.f32 %v2053_v50, %v1882_v56 }
 0xcd6   : > { %1899 = vst [vmem:[%s535_s0] sm:$0xff] %v1897_v57  ;;  %v1898_v61 = vadd.f32 %v2054_v52, %v1890_v59 }
 0xcd8   : > { %1900 = vst [vmem:[%s535_s0 + $0x8] sm:$0xff] %v1898_v61 }
 0xcd9 PF: > { %s26_s21 = sadd.s32 1, %s2362_s21  }
 0xcda   : > { %p23_p4 = scmp.ge.s32.totalorder %s26_s21, 4  }
 0xcdc   :  { %25 = sbr.rel (!%p23_p4) target bundleno = 2 (0x2), region = 117 }

</bundles_post_ra>
